<compile_context>
chip_gen: v5e
topology: v5e:2x2
jax: 0.10.0
libtpu: 0.0.40
codegen_flags: <defaults>
</compile_context>

<pallas_src>
import jax
import jax.numpy as jnp
from jax.experimental import pallas as pl
from jax.experimental.pallas import tpu as pltpu

NUM_HIDDENS = 128
NUM_OUTPUTS = 1


def _lstm_kernel(x_ref, wih_ref, bias_ref, whh_ref, wfc_ref, bfc_ref, out_ref):
    """x_ref:    (T, Bt, 1) f32   raw input sequence (batch tile)
       wih_ref:  (1, 4H)    f32   W_ih row (input_size == 1)
       bias_ref: (1, 4H)    f32   b_ih + b_hh
       whh_ref:  (H, 4H)    bf16/f32 (W_hh^T)
       wfc_ref:  (1, H)     f32   W_fc row
       bfc_ref:  (1, 1)     f32   b_fc
       out_ref:  (Bt, 1)    f32
    """
    T = x_ref.shape[0]
    Bt = x_ref.shape[1]
    H = whh_ref.shape[0]
    mat_dtype = whh_ref.dtype

    # Hoist loop-invariant loads.
    wih = wih_ref[...]      # (1, 4H)
    bias = bias_ref[...]    # (1, 4H)

    h0 = jnp.zeros((Bt, H), jnp.float32)
    c0 = jnp.zeros((Bt, H), jnp.float32)

    def sigm(v):
        # sigmoid(x) == 0.5 * (1 + tanh(x / 2)): exactly one EUP op per gate.
        return 0.5 * (jnp.tanh(0.5 * v) + 1.0)

    def step(t, carry):
        h, c = carry
        x_t = x_ref[t]                                   # (Bt, 1)
        # In-kernel input projection (VPU) + recurrence matmul (MXU, f32 acc).
        gates = (x_t * wih + bias
                 + jnp.dot(h.astype(mat_dtype), whh_ref[...],
                           preferred_element_type=jnp.float32))
        i_g = sigm(gates[:, 0 * H:1 * H])
        f_g = sigm(gates[:, 1 * H:2 * H])
        g_g = jnp.tanh(gates[:, 2 * H:3 * H])
        o_g = sigm(gates[:, 3 * H:4 * H])
        c_new = f_g * c + i_g * g_g
        h_new = o_g * jnp.tanh(c_new)
        return h_new, c_new

    unroll = True if T <= 16 else 8
    h_T, _ = jax.lax.fori_loop(0, T, step, (h0, c0), unroll=unroll)

    # fc(r_out[:, -1, :]) == fc(h_T). N=1 output -> VPU multiply + lane reduce.
    out_ref[...] = (jnp.sum(h_T * wfc_ref[...], axis=-1, keepdims=True)
                    + bfc_ref[...])


def lstm_forward(x, params, *, matmul_dtype=jnp.bfloat16, batch_tile=256):
    """x: (B, T) float32. Returns (B, NUM_OUTPUTS) float32."""
    w_ih, w_hh, b_ih, b_hh, w_fc, b_fc = params
    B, T = x.shape
    H = NUM_HIDDENS

    # Batch tile: multiple of 8 (sublane-dense state), capped so large batches
    # shard across grid steps / TensorCores.
    Bt = min(((B + 7) // 8) * 8, batch_tile)
    Bt = ((Bt + 7) // 8) * 8
    n_tiles = (B + Bt - 1) // Bt
    Bp = n_tiles * Bt

    x_p = jnp.zeros((Bp, T), jnp.float32).at[:B].set(x.astype(jnp.float32))
    x_k = jnp.transpose(x_p, (1, 0))[..., None]                  # (T, Bp, 1)

    wih_k = w_ih.reshape(1, 4 * H).astype(jnp.float32)           # (1, 4H)
    bias_k = (b_ih + b_hh).reshape(1, 4 * H).astype(jnp.float32)  # (1, 4H)
    whh_k = jnp.transpose(w_hh, (1, 0)).astype(matmul_dtype)     # (H, 4H)
    wfc_k = w_fc.reshape(1, H).astype(jnp.float32)               # (1, H)
    bfc_k = b_fc.reshape(1, 1).astype(jnp.float32)               # (1, 1)

    out = pl.pallas_call(
        _lstm_kernel,
        out_shape=jax.ShapeDtypeStruct((Bp, NUM_OUTPUTS), jnp.float32),
        grid=(n_tiles,),
        in_specs=[
            pl.BlockSpec((T, Bt, 1), lambda b: (0, b, 0)),       # x stream
            pl.BlockSpec((1, 4 * H), lambda b: (0, 0)),          # W_ih row
            pl.BlockSpec((1, 4 * H), lambda b: (0, 0)),          # b_ih + b_hh
            pl.BlockSpec((H, 4 * H), lambda b: (0, 0)),          # W_hh^T
            pl.BlockSpec((1, H), lambda b: (0, 0)),              # W_fc row
            pl.BlockSpec((1, 1), lambda b: (0, 0)),              # b_fc
        ],
        out_specs=pl.BlockSpec((Bt, NUM_OUTPUTS), lambda b: (b, 0)),
        compiler_params=pltpu.CompilerParams(
            dimension_semantics=("parallel",)),
    )(x_k, wih_k, bias_k, whh_k, wfc_k, bfc_k)
    return out[:B]


def lstm_reference(x, params):
    """Pure-JAX reference matching PyTorch nn.LSTM + Linear semantics (f32)."""
    w_ih, w_hh, b_ih, b_hh, w_fc, b_fc = params
    B, T = x.shape
    H = NUM_HIDDENS
    xs = x.reshape(B, T, 1)

    def step(carry, x_t):
        h, c = carry
        gates = x_t @ w_ih.T + h @ w_hh.T + b_ih + b_hh
        i = jax.nn.sigmoid(gates[:, 0 * H:1 * H])
        f = jax.nn.sigmoid(gates[:, 1 * H:2 * H])
        g = jnp.tanh(gates[:, 2 * H:3 * H])
        o = jax.nn.sigmoid(gates[:, 3 * H:4 * H])
        c = f * c + i * g
        h = o * jnp.tanh(c)
        return (h, c), None

    init = (jnp.zeros((B, H), jnp.float32), jnp.zeros((B, H), jnp.float32))
    (h_T, _), _ = jax.lax.scan(step, init, jnp.transpose(xs, (1, 0, 2)))
    return h_T @ w_fc.T + b_fc


def init_params(key):
    H = NUM_HIDDENS
    k = 1.0 / jnp.sqrt(jnp.float32(H))
    keys = jax.random.split(key, 6)
    w_ih = jax.random.uniform(keys[0], (4 * H, 1), jnp.float32, -k, k)
    w_hh = jax.random.uniform(keys[1], (4 * H, H), jnp.float32, -k, k)
    b_ih = jax.random.uniform(keys[2], (4 * H,), jnp.float32, -k, k)
    b_hh = jax.random.uniform(keys[3], (4 * H,), jnp.float32, -k, k)
    w_fc = jax.random.uniform(keys[4], (NUM_OUTPUTS, H), jnp.float32, -k, k)
    b_fc = jax.random.uniform(keys[5], (NUM_OUTPUTS,), jnp.float32, -k, k)
    return (w_ih, w_hh, b_ih, b_hh, w_fc, b_fc)


if __name__ == "__main__":
    key = jax.random.PRNGKey(0)
    k_x, k_p = jax.random.split(key)

    B, T = 2, 8
    x = jax.random.normal(k_x, (B, T), jnp.float32)
    params = init_params(k_p)

    ref = jax.block_until_ready(lstm_reference(x, params))

    # Exact-semantics check: f32 recurrence weights (tanh-form sigmoid only
    # differs by rounding from the exp-form reference).
    out_f32 = jax.block_until_ready(
        lstm_forward(x, params, matmul_dtype=jnp.float32))
    assert out_f32.shape == (B, NUM_OUTPUTS)
    assert jnp.allclose(out_f32, ref, atol=1e-4, rtol=1e-4)

    # Fast path: bf16 MXU operands for W_hh^T / h, f32 accumulation and state.
    # (bf16 h-rounding compounds with T; tolerance validated at short T only.)
    out_bf16 = jax.block_until_ready(
        lstm_forward(x, params, matmul_dtype=jnp.bfloat16))
    assert out_bf16.shape == (B, NUM_OUTPUTS)
    assert jnp.allclose(out_bf16, ref, atol=5e-2, rtol=5e-2)

    print("KERNEL_OK")
</pallas_src>

<mosaic_0001>
module attributes {stable_mosaic.version = 11 : i64} {
  func.func @_lstm_kernel(%arg0: i32, %arg1: memref<8x8x1xf32, #tpu.memory_space<vmem>>, %arg2: memref<1x512xf32, #tpu.memory_space<vmem>>, %arg3: memref<1x512xf32, #tpu.memory_space<vmem>>, %arg4: memref<128x512xf32, #tpu.memory_space<vmem>>, %arg5: memref<1x128xf32, #tpu.memory_space<vmem>>, %arg6: memref<1x1xf32, #tpu.memory_space<vmem>>, %arg7: memref<8x1xf32, #tpu.memory_space<vmem>>) attributes {dimension_semantics = [#tpu.dimension_semantics<parallel>], iteration_bounds = array<i64: 1>, scalar_prefetch = 0 : i64, scratch_operands = 0 : i64, tpu.core_type = #tpu.core_type<tc>, window_params = [{transform_indices = @transform_0, window_bounds = array<i64: 8, 8, 1>}, {pipeline_mode = #tpu.pipeline_mode<synchronous>, transform_indices = @transform_1, window_bounds = array<i64: 1, 512>}, {pipeline_mode = #tpu.pipeline_mode<synchronous>, transform_indices = @transform_2, window_bounds = array<i64: 1, 512>}, {pipeline_mode = #tpu.pipeline_mode<synchronous>, transform_indices = @transform_3, window_bounds = array<i64: 128, 512>}, {pipeline_mode = #tpu.pipeline_mode<synchronous>, transform_indices = @transform_4, window_bounds = array<i64: 1, 128>}, {pipeline_mode = #tpu.pipeline_mode<synchronous>, transform_indices = @transform_5, window_bounds = array<i64: 1, 1>}, {transform_indices = @transform_6, window_bounds = array<i64: 8, 1>}]} {
    %c0 = arith.constant 0 : index
    %c0_0 = arith.constant 0 : index
    %0 = vector.load %arg2[%c0, %c0_0] : memref<1x512xf32, #tpu.memory_space<vmem>>, vector<1x512xf32>
    %c0_1 = arith.constant 0 : index
    %c0_2 = arith.constant 0 : index
    %1 = vector.load %arg3[%c0_1, %c0_2] : memref<1x512xf32, #tpu.memory_space<vmem>>, vector<1x512xf32>
    %cst = arith.constant 0.000000e+00 : f32
    %2 = vector.broadcast %cst : f32 to vector<8x128xf32>
    %cst_3 = arith.constant 0.000000e+00 : f32
    %3 = vector.broadcast %cst_3 : f32 to vector<8x128xf32>
    %c0_i32 = arith.constant 0 : i32
    %4 = arith.index_cast %c0_i32 : i32 to index
    %c0_4 = arith.constant 0 : index
    %c0_5 = arith.constant 0 : index
    %5 = vector.load %arg1[%4, %c0_4, %c0_5] : memref<8x8x1xf32, #tpu.memory_space<vmem>>, vector<1x8x1xf32>
    %6 = vector.shape_cast %5 : vector<1x8x1xf32> to vector<8x1xf32>
    %7 = vector.broadcast %6 : vector<8x1xf32> to vector<8x512xf32>
    %8 = vector.broadcast %0 : vector<1x512xf32> to vector<8x512xf32>
    %9 = arith.mulf %7, %8 : vector<8x512xf32>
    %10 = vector.broadcast %1 : vector<1x512xf32> to vector<8x512xf32>
    %11 = arith.addf %9, %10 : vector<8x512xf32>
    %c0_6 = arith.constant 0 : index
    %c0_7 = arith.constant 0 : index
    %12 = vector.load %arg4[%c0_6, %c0_7] : memref<128x512xf32, #tpu.memory_space<vmem>>, vector<128x512xf32>
    %cst_8 = arith.constant dense<0.000000e+00> : vector<8x512xf32>
    %13 = tpu.matmul %2, %12, %cst_8 {dimension_numbers = #tpu.dot_dimension_numbers<[1], [0], [0], [1], [0, 0, 1, 1], [], []>} : vector<8x128xf32>, vector<128x512xf32>, vector<8x512xf32> -> vector<8x512xf32>
    %14 = arith.addf %11, %13 : vector<8x512xf32>
    %15 = vector.extract_strided_slice %14 {offsets = [0, 0], sizes = [8, 128], strides = [1, 1]} : vector<8x512xf32> to vector<8x128xf32>
    %cst_9 = arith.constant 5.000000e-01 : f32
    %16 = vector.broadcast %cst_9 : f32 to vector<8x128xf32>
    %17 = arith.mulf %16, %15 : vector<8x128xf32>
    %18 = math.tanh %17 : vector<8x128xf32>
    %cst_10 = arith.constant 1.000000e+00 : f32
    %19 = vector.broadcast %cst_10 : f32 to vector<8x128xf32>
    %20 = arith.addf %18, %19 : vector<8x128xf32>
    %cst_11 = arith.constant 5.000000e-01 : f32
    %21 = vector.broadcast %cst_11 : f32 to vector<8x128xf32>
    %22 = arith.mulf %21, %20 : vector<8x128xf32>
    %23 = vector.extract_strided_slice %14 {offsets = [0, 128], sizes = [8, 128], strides = [1, 1]} : vector<8x512xf32> to vector<8x128xf32>
    %cst_12 = arith.constant 5.000000e-01 : f32
    %24 = vector.broadcast %cst_12 : f32 to vector<8x128xf32>
    %25 = arith.mulf %24, %23 : vector<8x128xf32>
    %26 = math.tanh %25 : vector<8x128xf32>
    %cst_13 = arith.constant 1.000000e+00 : f32
    %27 = vector.broadcast %cst_13 : f32 to vector<8x128xf32>
    %28 = arith.addf %26, %27 : vector<8x128xf32>
    %cst_14 = arith.constant 5.000000e-01 : f32
    %29 = vector.broadcast %cst_14 : f32 to vector<8x128xf32>
    %30 = arith.mulf %29, %28 : vector<8x128xf32>
    %31 = vector.extract_strided_slice %14 {offsets = [0, 256], sizes = [8, 128], strides = [1, 1]} : vector<8x512xf32> to vector<8x128xf32>
    %32 = math.tanh %31 : vector<8x128xf32>
    %33 = vector.extract_strided_slice %14 {offsets = [0, 384], sizes = [8, 128], strides = [1, 1]} : vector<8x512xf32> to vector<8x128xf32>
    %cst_15 = arith.constant 5.000000e-01 : f32
    %34 = vector.broadcast %cst_15 : f32 to vector<8x128xf32>
    %35 = arith.mulf %34, %33 : vector<8x128xf32>
    %36 = math.tanh %35 : vector<8x128xf32>
    %cst_16 = arith.constant 1.000000e+00 : f32
    %37 = vector.broadcast %cst_16 : f32 to vector<8x128xf32>
    %38 = arith.addf %36, %37 : vector<8x128xf32>
    %cst_17 = arith.constant 5.000000e-01 : f32
    %39 = vector.broadcast %cst_17 : f32 to vector<8x128xf32>
    %40 = arith.mulf %39, %38 : vector<8x128xf32>
    %41 = arith.mulf %30, %3 : vector<8x128xf32>
    %42 = arith.mulf %22, %32 : vector<8x128xf32>
    %43 = arith.addf %41, %42 : vector<8x128xf32>
    %44 = math.tanh %43 : vector<8x128xf32>
    %45 = arith.mulf %40, %44 : vector<8x128xf32>
    %c1_i32 = arith.constant 1 : i32
    %46 = arith.index_cast %c1_i32 : i32 to index
    %c0_18 = arith.constant 0 : index
    %c0_19 = arith.constant 0 : index
    %47 = vector.load %arg1[%46, %c0_18, %c0_19] : memref<8x8x1xf32, #tpu.memory_space<vmem>>, vector<1x8x1xf32>
    %48 = vector.shape_cast %47 : vector<1x8x1xf32> to vector<8x1xf32>
    %49 = vector.broadcast %48 : vector<8x1xf32> to vector<8x512xf32>
    %50 = vector.broadcast %0 : vector<1x512xf32> to vector<8x512xf32>
    %51 = arith.mulf %49, %50 : vector<8x512xf32>
    %52 = vector.broadcast %1 : vector<1x512xf32> to vector<8x512xf32>
    %53 = arith.addf %51, %52 : vector<8x512xf32>
    %c0_20 = arith.constant 0 : index
    %c0_21 = arith.constant 0 : index
    %54 = vector.load %arg4[%c0_20, %c0_21] : memref<128x512xf32, #tpu.memory_space<vmem>>, vector<128x512xf32>
    %cst_22 = arith.constant dense<0.000000e+00> : vector<8x512xf32>
    %55 = tpu.matmul %45, %54, %cst_22 {dimension_numbers = #tpu.dot_dimension_numbers<[1], [0], [0], [1], [0, 0, 1, 1], [], []>} : vector<8x128xf32>, vector<128x512xf32>, vector<8x512xf32> -> vector<8x512xf32>
    %56 = arith.addf %53, %55 : vector<8x512xf32>
    %57 = vector.extract_strided_slice %56 {offsets = [0, 0], sizes = [8, 128], strides = [1, 1]} : vector<8x512xf32> to vector<8x128xf32>
    %cst_23 = arith.constant 5.000000e-01 : f32
    %58 = vector.broadcast %cst_23 : f32 to vector<8x128xf32>
    %59 = arith.mulf %58, %57 : vector<8x128xf32>
    %60 = math.tanh %59 : vector<8x128xf32>
    %cst_24 = arith.constant 1.000000e+00 : f32
    %61 = vector.broadcast %cst_24 : f32 to vector<8x128xf32>
    %62 = arith.addf %60, %61 : vector<8x128xf32>
    %cst_25 = arith.constant 5.000000e-01 : f32
    %63 = vector.broadcast %cst_25 : f32 to vector<8x128xf32>
    %64 = arith.mulf %63, %62 : vector<8x128xf32>
    %65 = vector.extract_strided_slice %56 {offsets = [0, 128], sizes = [8, 128], strides = [1, 1]} : vector<8x512xf32> to vector<8x128xf32>
    %cst_26 = arith.constant 5.000000e-01 : f32
    %66 = vector.broadcast %cst_26 : f32 to vector<8x128xf32>
    %67 = arith.mulf %66, %65 : vector<8x128xf32>
    %68 = math.tanh %67 : vector<8x128xf32>
    %cst_27 = arith.constant 1.000000e+00 : f32
    %69 = vector.broadcast %cst_27 : f32 to vector<8x128xf32>
    %70 = arith.addf %68, %69 : vector<8x128xf32>
    %cst_28 = arith.constant 5.000000e-01 : f32
    %71 = vector.broadcast %cst_28 : f32 to vector<8x128xf32>
    %72 = arith.mulf %71, %70 : vector<8x128xf32>
    %73 = vector.extract_strided_slice %56 {offsets = [0, 256], sizes = [8, 128], strides = [1, 1]} : vector<8x512xf32> to vector<8x128xf32>
    %74 = math.tanh %73 : vector<8x128xf32>
    %75 = vector.extract_strided_slice %56 {offsets = [0, 384], sizes = [8, 128], strides = [1, 1]} : vector<8x512xf32> to vector<8x128xf32>
    %cst_29 = arith.constant 5.000000e-01 : f32
    %76 = vector.broadcast %cst_29 : f32 to vector<8x128xf32>
    %77 = arith.mulf %76, %75 : vector<8x128xf32>
    %78 = math.tanh %77 : vector<8x128xf32>
    %cst_30 = arith.constant 1.000000e+00 : f32
    %79 = vector.broadcast %cst_30 : f32 to vector<8x128xf32>
    %80 = arith.addf %78, %79 : vector<8x128xf32>
    %cst_31 = arith.constant 5.000000e-01 : f32
    %81 = vector.broadcast %cst_31 : f32 to vector<8x128xf32>
    %82 = arith.mulf %81, %80 : vector<8x128xf32>
    %83 = arith.mulf %72, %43 : vector<8x128xf32>
    %84 = arith.mulf %64, %74 : vector<8x128xf32>
    %85 = arith.addf %83, %84 : vector<8x128xf32>
    %86 = math.tanh %85 : vector<8x128xf32>
    %87 = arith.mulf %82, %86 : vector<8x128xf32>
    %c2_i32 = arith.constant 2 : i32
    %88 = arith.index_cast %c2_i32 : i32 to index
    %c0_32 = arith.constant 0 : index
    %c0_33 = arith.constant 0 : index
    %89 = vector.load %arg1[%88, %c0_32, %c0_33] : memref<8x8x1xf32, #tpu.memory_space<vmem>>, vector<1x8x1xf32>
    %90 = vector.shape_cast %89 : vector<1x8x1xf32> to vector<8x1xf32>
    %91 = vector.broadcast %90 : vector<8x1xf32> to vector<8x512xf32>
    %92 = vector.broadcast %0 : vector<1x512xf32> to vector<8x512xf32>
    %93 = arith.mulf %91, %92 : vector<8x512xf32>
    %94 = vector.broadcast %1 : vector<1x512xf32> to vector<8x512xf32>
    %95 = arith.addf %93, %94 : vector<8x512xf32>
    %c0_34 = arith.constant 0 : index
    %c0_35 = arith.constant 0 : index
    %96 = vector.load %arg4[%c0_34, %c0_35] : memref<128x512xf32, #tpu.memory_space<vmem>>, vector<128x512xf32>
    %cst_36 = arith.constant dense<0.000000e+00> : vector<8x512xf32>
    %97 = tpu.matmul %87, %96, %cst_36 {dimension_numbers = #tpu.dot_dimension_numbers<[1], [0], [0], [1], [0, 0, 1, 1], [], []>} : vector<8x128xf32>, vector<128x512xf32>, vector<8x512xf32> -> vector<8x512xf32>
    %98 = arith.addf %95, %97 : vector<8x512xf32>
    %99 = vector.extract_strided_slice %98 {offsets = [0, 0], sizes = [8, 128], strides = [1, 1]} : vector<8x512xf32> to vector<8x128xf32>
    %cst_37 = arith.constant 5.000000e-01 : f32
    %100 = vector.broadcast %cst_37 : f32 to vector<8x128xf32>
    %101 = arith.mulf %100, %99 : vector<8x128xf32>
    %102 = math.tanh %101 : vector<8x128xf32>
    %cst_38 = arith.constant 1.000000e+00 : f32
    %103 = vector.broadcast %cst_38 : f32 to vector<8x128xf32>
    %104 = arith.addf %102, %103 : vector<8x128xf32>
    %cst_39 = arith.constant 5.000000e-01 : f32
    %105 = vector.broadcast %cst_39 : f32 to vector<8x128xf32>
    %106 = arith.mulf %105, %104 : vector<8x128xf32>
    %107 = vector.extract_strided_slice %98 {offsets = [0, 128], sizes = [8, 128], strides = [1, 1]} : vector<8x512xf32> to vector<8x128xf32>
    %cst_40 = arith.constant 5.000000e-01 : f32
    %108 = vector.broadcast %cst_40 : f32 to vector<8x128xf32>
    %109 = arith.mulf %108, %107 : vector<8x128xf32>
    %110 = math.tanh %109 : vector<8x128xf32>
    %cst_41 = arith.constant 1.000000e+00 : f32
    %111 = vector.broadcast %cst_41 : f32 to vector<8x128xf32>
    %112 = arith.addf %110, %111 : vector<8x128xf32>
    %cst_42 = arith.constant 5.000000e-01 : f32
    %113 = vector.broadcast %cst_42 : f32 to vector<8x128xf32>
    %114 = arith.mulf %113, %112 : vector<8x128xf32>
    %115 = vector.extract_strided_slice %98 {offsets = [0, 256], sizes = [8, 128], strides = [1, 1]} : vector<8x512xf32> to vector<8x128xf32>
    %116 = math.tanh %115 : vector<8x128xf32>
    %117 = vector.extract_strided_slice %98 {offsets = [0, 384], sizes = [8, 128], strides = [1, 1]} : vector<8x512xf32> to vector<8x128xf32>
    %cst_43 = arith.constant 5.000000e-01 : f32
    %118 = vector.broadcast %cst_43 : f32 to vector<8x128xf32>
    %119 = arith.mulf %118, %117 : vector<8x128xf32>
    %120 = math.tanh %119 : vector<8x128xf32>
    %cst_44 = arith.constant 1.000000e+00 : f32
    %121 = vector.broadcast %cst_44 : f32 to vector<8x128xf32>
    %122 = arith.addf %120, %121 : vector<8x128xf32>
    %cst_45 = arith.constant 5.000000e-01 : f32
    %123 = vector.broadcast %cst_45 : f32 to vector<8x128xf32>
    %124 = arith.mulf %123, %122 : vector<8x128xf32>
    %125 = arith.mulf %114, %85 : vector<8x128xf32>
    %126 = arith.mulf %106, %116 : vector<8x128xf32>
    %127 = arith.addf %125, %126 : vector<8x128xf32>
    %128 = math.tanh %127 : vector<8x128xf32>
    %129 = arith.mulf %124, %128 : vector<8x128xf32>
    %c3_i32 = arith.constant 3 : i32
    %130 = arith.index_cast %c3_i32 : i32 to index
    %c0_46 = arith.constant 0 : index
    %c0_47 = arith.constant 0 : index
    %131 = vector.load %arg1[%130, %c0_46, %c0_47] : memref<8x8x1xf32, #tpu.memory_space<vmem>>, vector<1x8x1xf32>
    %132 = vector.shape_cast %131 : vector<1x8x1xf32> to vector<8x1xf32>
    %133 = vector.broadcast %132 : vector<8x1xf32> to vector<8x512xf32>
    %134 = vector.broadcast %0 : vector<1x512xf32> to vector<8x512xf32>
    %135 = arith.mulf %133, %134 : vector<8x512xf32>
    %136 = vector.broadcast %1 : vector<1x512xf32> to vector<8x512xf32>
    %137 = arith.addf %135, %136 : vector<8x512xf32>
    %c0_48 = arith.constant 0 : index
    %c0_49 = arith.constant 0 : index
    %138 = vector.load %arg4[%c0_48, %c0_49] : memref<128x512xf32, #tpu.memory_space<vmem>>, vector<128x512xf32>
    %cst_50 = arith.constant dense<0.000000e+00> : vector<8x512xf32>
    %139 = tpu.matmul %129, %138, %cst_50 {dimension_numbers = #tpu.dot_dimension_numbers<[1], [0], [0], [1], [0, 0, 1, 1], [], []>} : vector<8x128xf32>, vector<128x512xf32>, vector<8x512xf32> -> vector<8x512xf32>
    %140 = arith.addf %137, %139 : vector<8x512xf32>
    %141 = vector.extract_strided_slice %140 {offsets = [0, 0], sizes = [8, 128], strides = [1, 1]} : vector<8x512xf32> to vector<8x128xf32>
    %cst_51 = arith.constant 5.000000e-01 : f32
    %142 = vector.broadcast %cst_51 : f32 to vector<8x128xf32>
    %143 = arith.mulf %142, %141 : vector<8x128xf32>
    %144 = math.tanh %143 : vector<8x128xf32>
    %cst_52 = arith.constant 1.000000e+00 : f32
    %145 = vector.broadcast %cst_52 : f32 to vector<8x128xf32>
    %146 = arith.addf %144, %145 : vector<8x128xf32>
    %cst_53 = arith.constant 5.000000e-01 : f32
    %147 = vector.broadcast %cst_53 : f32 to vector<8x128xf32>
    %148 = arith.mulf %147, %146 : vector<8x128xf32>
    %149 = vector.extract_strided_slice %140 {offsets = [0, 128], sizes = [8, 128], strides = [1, 1]} : vector<8x512xf32> to vector<8x128xf32>
    %cst_54 = arith.constant 5.000000e-01 : f32
    %150 = vector.broadcast %cst_54 : f32 to vector<8x128xf32>
    %151 = arith.mulf %150, %149 : vector<8x128xf32>
    %152 = math.tanh %151 : vector<8x128xf32>
    %cst_55 = arith.constant 1.000000e+00 : f32
    %153 = vector.broadcast %cst_55 : f32 to vector<8x128xf32>
    %154 = arith.addf %152, %153 : vector<8x128xf32>
    %cst_56 = arith.constant 5.000000e-01 : f32
    %155 = vector.broadcast %cst_56 : f32 to vector<8x128xf32>
    %156 = arith.mulf %155, %154 : vector<8x128xf32>
    %157 = vector.extract_strided_slice %140 {offsets = [0, 256], sizes = [8, 128], strides = [1, 1]} : vector<8x512xf32> to vector<8x128xf32>
    %158 = math.tanh %157 : vector<8x128xf32>
    %159 = vector.extract_strided_slice %140 {offsets = [0, 384], sizes = [8, 128], strides = [1, 1]} : vector<8x512xf32> to vector<8x128xf32>
    %cst_57 = arith.constant 5.000000e-01 : f32
    %160 = vector.broadcast %cst_57 : f32 to vector<8x128xf32>
    %161 = arith.mulf %160, %159 : vector<8x128xf32>
    %162 = math.tanh %161 : vector<8x128xf32>
    %cst_58 = arith.constant 1.000000e+00 : f32
    %163 = vector.broadcast %cst_58 : f32 to vector<8x128xf32>
    %164 = arith.addf %162, %163 : vector<8x128xf32>
    %cst_59 = arith.constant 5.000000e-01 : f32
    %165 = vector.broadcast %cst_59 : f32 to vector<8x128xf32>
    %166 = arith.mulf %165, %164 : vector<8x128xf32>
    %167 = arith.mulf %156, %127 : vector<8x128xf32>
    %168 = arith.mulf %148, %158 : vector<8x128xf32>
    %169 = arith.addf %167, %168 : vector<8x128xf32>
    %170 = math.tanh %169 : vector<8x128xf32>
    %171 = arith.mulf %166, %170 : vector<8x128xf32>
    %c4_i32 = arith.constant 4 : i32
    %172 = arith.index_cast %c4_i32 : i32 to index
    %c0_60 = arith.constant 0 : index
    %c0_61 = arith.constant 0 : index
    %173 = vector.load %arg1[%172, %c0_60, %c0_61] : memref<8x8x1xf32, #tpu.memory_space<vmem>>, vector<1x8x1xf32>
    %174 = vector.shape_cast %173 : vector<1x8x1xf32> to vector<8x1xf32>
    %175 = vector.broadcast %174 : vector<8x1xf32> to vector<8x512xf32>
    %176 = vector.broadcast %0 : vector<1x512xf32> to vector<8x512xf32>
    %177 = arith.mulf %175, %176 : vector<8x512xf32>
    %178 = vector.broadcast %1 : vector<1x512xf32> to vector<8x512xf32>
    %179 = arith.addf %177, %178 : vector<8x512xf32>
    %c0_62 = arith.constant 0 : index
    %c0_63 = arith.constant 0 : index
    %180 = vector.load %arg4[%c0_62, %c0_63] : memref<128x512xf32, #tpu.memory_space<vmem>>, vector<128x512xf32>
    %cst_64 = arith.constant dense<0.000000e+00> : vector<8x512xf32>
    %181 = tpu.matmul %171, %180, %cst_64 {dimension_numbers = #tpu.dot_dimension_numbers<[1], [0], [0], [1], [0, 0, 1, 1], [], []>} : vector<8x128xf32>, vector<128x512xf32>, vector<8x512xf32> -> vector<8x512xf32>
    %182 = arith.addf %179, %181 : vector<8x512xf32>
    %183 = vector.extract_strided_slice %182 {offsets = [0, 0], sizes = [8, 128], strides = [1, 1]} : vector<8x512xf32> to vector<8x128xf32>
    %cst_65 = arith.constant 5.000000e-01 : f32
    %184 = vector.broadcast %cst_65 : f32 to vector<8x128xf32>
    %185 = arith.mulf %184, %183 : vector<8x128xf32>
    %186 = math.tanh %185 : vector<8x128xf32>
    %cst_66 = arith.constant 1.000000e+00 : f32
    %187 = vector.broadcast %cst_66 : f32 to vector<8x128xf32>
    %188 = arith.addf %186, %187 : vector<8x128xf32>
    %cst_67 = arith.constant 5.000000e-01 : f32
    %189 = vector.broadcast %cst_67 : f32 to vector<8x128xf32>
    %190 = arith.mulf %189, %188 : vector<8x128xf32>
    %191 = vector.extract_strided_slice %182 {offsets = [0, 128], sizes = [8, 128], strides = [1, 1]} : vector<8x512xf32> to vector<8x128xf32>
    %cst_68 = arith.constant 5.000000e-01 : f32
    %192 = vector.broadcast %cst_68 : f32 to vector<8x128xf32>
    %193 = arith.mulf %192, %191 : vector<8x128xf32>
    %194 = math.tanh %193 : vector<8x128xf32>
    %cst_69 = arith.constant 1.000000e+00 : f32
    %195 = vector.broadcast %cst_69 : f32 to vector<8x128xf32>
    %196 = arith.addf %194, %195 : vector<8x128xf32>
    %cst_70 = arith.constant 5.000000e-01 : f32
    %197 = vector.broadcast %cst_70 : f32 to vector<8x128xf32>
    %198 = arith.mulf %197, %196 : vector<8x128xf32>
    %199 = vector.extract_strided_slice %182 {offsets = [0, 256], sizes = [8, 128], strides = [1, 1]} : vector<8x512xf32> to vector<8x128xf32>
    %200 = math.tanh %199 : vector<8x128xf32>
    %201 = vector.extract_strided_slice %182 {offsets = [0, 384], sizes = [8, 128], strides = [1, 1]} : vector<8x512xf32> to vector<8x128xf32>
    %cst_71 = arith.constant 5.000000e-01 : f32
    %202 = vector.broadcast %cst_71 : f32 to vector<8x128xf32>
    %203 = arith.mulf %202, %201 : vector<8x128xf32>
    %204 = math.tanh %203 : vector<8x128xf32>
    %cst_72 = arith.constant 1.000000e+00 : f32
    %205 = vector.broadcast %cst_72 : f32 to vector<8x128xf32>
    %206 = arith.addf %204, %205 : vector<8x128xf32>
    %cst_73 = arith.constant 5.000000e-01 : f32
    %207 = vector.broadcast %cst_73 : f32 to vector<8x128xf32>
    %208 = arith.mulf %207, %206 : vector<8x128xf32>
    %209 = arith.mulf %198, %169 : vector<8x128xf32>
    %210 = arith.mulf %190, %200 : vector<8x128xf32>
    %211 = arith.addf %209, %210 : vector<8x128xf32>
    %212 = math.tanh %211 : vector<8x128xf32>
    %213 = arith.mulf %208, %212 : vector<8x128xf32>
    %c5_i32 = arith.constant 5 : i32
    %214 = arith.index_cast %c5_i32 : i32 to index
    %c0_74 = arith.constant 0 : index
    %c0_75 = arith.constant 0 : index
    %215 = vector.load %arg1[%214, %c0_74, %c0_75] : memref<8x8x1xf32, #tpu.memory_space<vmem>>, vector<1x8x1xf32>
    %216 = vector.shape_cast %215 : vector<1x8x1xf32> to vector<8x1xf32>
    %217 = vector.broadcast %216 : vector<8x1xf32> to vector<8x512xf32>
    %218 = vector.broadcast %0 : vector<1x512xf32> to vector<8x512xf32>
    %219 = arith.mulf %217, %218 : vector<8x512xf32>
    %220 = vector.broadcast %1 : vector<1x512xf32> to vector<8x512xf32>
    %221 = arith.addf %219, %220 : vector<8x512xf32>
    %c0_76 = arith.constant 0 : index
    %c0_77 = arith.constant 0 : index
    %222 = vector.load %arg4[%c0_76, %c0_77] : memref<128x512xf32, #tpu.memory_space<vmem>>, vector<128x512xf32>
    %cst_78 = arith.constant dense<0.000000e+00> : vector<8x512xf32>
    %223 = tpu.matmul %213, %222, %cst_78 {dimension_numbers = #tpu.dot_dimension_numbers<[1], [0], [0], [1], [0, 0, 1, 1], [], []>} : vector<8x128xf32>, vector<128x512xf32>, vector<8x512xf32> -> vector<8x512xf32>
    %224 = arith.addf %221, %223 : vector<8x512xf32>
    %225 = vector.extract_strided_slice %224 {offsets = [0, 0], sizes = [8, 128], strides = [1, 1]} : vector<8x512xf32> to vector<8x128xf32>
    %cst_79 = arith.constant 5.000000e-01 : f32
    %226 = vector.broadcast %cst_79 : f32 to vector<8x128xf32>
    %227 = arith.mulf %226, %225 : vector<8x128xf32>
    %228 = math.tanh %227 : vector<8x128xf32>
    %cst_80 = arith.constant 1.000000e+00 : f32
    %229 = vector.broadcast %cst_80 : f32 to vector<8x128xf32>
    %230 = arith.addf %228, %229 : vector<8x128xf32>
    %cst_81 = arith.constant 5.000000e-01 : f32
    %231 = vector.broadcast %cst_81 : f32 to vector<8x128xf32>
    %232 = arith.mulf %231, %230 : vector<8x128xf32>
    %233 = vector.extract_strided_slice %224 {offsets = [0, 128], sizes = [8, 128], strides = [1, 1]} : vector<8x512xf32> to vector<8x128xf32>
    %cst_82 = arith.constant 5.000000e-01 : f32
    %234 = vector.broadcast %cst_82 : f32 to vector<8x128xf32>
    %235 = arith.mulf %234, %233 : vector<8x128xf32>
    %236 = math.tanh %235 : vector<8x128xf32>
    %cst_83 = arith.constant 1.000000e+00 : f32
    %237 = vector.broadcast %cst_83 : f32 to vector<8x128xf32>
    %238 = arith.addf %236, %237 : vector<8x128xf32>
    %cst_84 = arith.constant 5.000000e-01 : f32
    %239 = vector.broadcast %cst_84 : f32 to vector<8x128xf32>
    %240 = arith.mulf %239, %238 : vector<8x128xf32>
    %241 = vector.extract_strided_slice %224 {offsets = [0, 256], sizes = [8, 128], strides = [1, 1]} : vector<8x512xf32> to vector<8x128xf32>
    %242 = math.tanh %241 : vector<8x128xf32>
    %243 = vector.extract_strided_slice %224 {offsets = [0, 384], sizes = [8, 128], strides = [1, 1]} : vector<8x512xf32> to vector<8x128xf32>
    %cst_85 = arith.constant 5.000000e-01 : f32
    %244 = vector.broadcast %cst_85 : f32 to vector<8x128xf32>
    %245 = arith.mulf %244, %243 : vector<8x128xf32>
    %246 = math.tanh %245 : vector<8x128xf32>
    %cst_86 = arith.constant 1.000000e+00 : f32
    %247 = vector.broadcast %cst_86 : f32 to vector<8x128xf32>
    %248 = arith.addf %246, %247 : vector<8x128xf32>
    %cst_87 = arith.constant 5.000000e-01 : f32
    %249 = vector.broadcast %cst_87 : f32 to vector<8x128xf32>
    %250 = arith.mulf %249, %248 : vector<8x128xf32>
    %251 = arith.mulf %240, %211 : vector<8x128xf32>
    %252 = arith.mulf %232, %242 : vector<8x128xf32>
    %253 = arith.addf %251, %252 : vector<8x128xf32>
    %254 = math.tanh %253 : vector<8x128xf32>
    %255 = arith.mulf %250, %254 : vector<8x128xf32>
    %c6_i32 = arith.constant 6 : i32
    %256 = arith.index_cast %c6_i32 : i32 to index
    %c0_88 = arith.constant 0 : index
    %c0_89 = arith.constant 0 : index
    %257 = vector.load %arg1[%256, %c0_88, %c0_89] : memref<8x8x1xf32, #tpu.memory_space<vmem>>, vector<1x8x1xf32>
    %258 = vector.shape_cast %257 : vector<1x8x1xf32> to vector<8x1xf32>
    %259 = vector.broadcast %258 : vector<8x1xf32> to vector<8x512xf32>
    %260 = vector.broadcast %0 : vector<1x512xf32> to vector<8x512xf32>
    %261 = arith.mulf %259, %260 : vector<8x512xf32>
    %262 = vector.broadcast %1 : vector<1x512xf32> to vector<8x512xf32>
    %263 = arith.addf %261, %262 : vector<8x512xf32>
    %c0_90 = arith.constant 0 : index
    %c0_91 = arith.constant 0 : index
    %264 = vector.load %arg4[%c0_90, %c0_91] : memref<128x512xf32, #tpu.memory_space<vmem>>, vector<128x512xf32>
    %cst_92 = arith.constant dense<0.000000e+00> : vector<8x512xf32>
    %265 = tpu.matmul %255, %264, %cst_92 {dimension_numbers = #tpu.dot_dimension_numbers<[1], [0], [0], [1], [0, 0, 1, 1], [], []>} : vector<8x128xf32>, vector<128x512xf32>, vector<8x512xf32> -> vector<8x512xf32>
    %266 = arith.addf %263, %265 : vector<8x512xf32>
    %267 = vector.extract_strided_slice %266 {offsets = [0, 0], sizes = [8, 128], strides = [1, 1]} : vector<8x512xf32> to vector<8x128xf32>
    %cst_93 = arith.constant 5.000000e-01 : f32
    %268 = vector.broadcast %cst_93 : f32 to vector<8x128xf32>
    %269 = arith.mulf %268, %267 : vector<8x128xf32>
    %270 = math.tanh %269 : vector<8x128xf32>
    %cst_94 = arith.constant 1.000000e+00 : f32
    %271 = vector.broadcast %cst_94 : f32 to vector<8x128xf32>
    %272 = arith.addf %270, %271 : vector<8x128xf32>
    %cst_95 = arith.constant 5.000000e-01 : f32
    %273 = vector.broadcast %cst_95 : f32 to vector<8x128xf32>
    %274 = arith.mulf %273, %272 : vector<8x128xf32>
    %275 = vector.extract_strided_slice %266 {offsets = [0, 128], sizes = [8, 128], strides = [1, 1]} : vector<8x512xf32> to vector<8x128xf32>
    %cst_96 = arith.constant 5.000000e-01 : f32
    %276 = vector.broadcast %cst_96 : f32 to vector<8x128xf32>
    %277 = arith.mulf %276, %275 : vector<8x128xf32>
    %278 = math.tanh %277 : vector<8x128xf32>
    %cst_97 = arith.constant 1.000000e+00 : f32
    %279 = vector.broadcast %cst_97 : f32 to vector<8x128xf32>
    %280 = arith.addf %278, %279 : vector<8x128xf32>
    %cst_98 = arith.constant 5.000000e-01 : f32
    %281 = vector.broadcast %cst_98 : f32 to vector<8x128xf32>
    %282 = arith.mulf %281, %280 : vector<8x128xf32>
    %283 = vector.extract_strided_slice %266 {offsets = [0, 256], sizes = [8, 128], strides = [1, 1]} : vector<8x512xf32> to vector<8x128xf32>
    %284 = math.tanh %283 : vector<8x128xf32>
    %285 = vector.extract_strided_slice %266 {offsets = [0, 384], sizes = [8, 128], strides = [1, 1]} : vector<8x512xf32> to vector<8x128xf32>
    %cst_99 = arith.constant 5.000000e-01 : f32
    %286 = vector.broadcast %cst_99 : f32 to vector<8x128xf32>
    %287 = arith.mulf %286, %285 : vector<8x128xf32>
    %288 = math.tanh %287 : vector<8x128xf32>
    %cst_100 = arith.constant 1.000000e+00 : f32
    %289 = vector.broadcast %cst_100 : f32 to vector<8x128xf32>
    %290 = arith.addf %288, %289 : vector<8x128xf32>
    %cst_101 = arith.constant 5.000000e-01 : f32
    %291 = vector.broadcast %cst_101 : f32 to vector<8x128xf32>
    %292 = arith.mulf %291, %290 : vector<8x128xf32>
    %293 = arith.mulf %282, %253 : vector<8x128xf32>
    %294 = arith.mulf %274, %284 : vector<8x128xf32>
    %295 = arith.addf %293, %294 : vector<8x128xf32>
    %296 = math.tanh %295 : vector<8x128xf32>
    %297 = arith.mulf %292, %296 : vector<8x128xf32>
    %c7_i32 = arith.constant 7 : i32
    %298 = arith.index_cast %c7_i32 : i32 to index
    %c0_102 = arith.constant 0 : index
    %c0_103 = arith.constant 0 : index
    %299 = vector.load %arg1[%298, %c0_102, %c0_103] : memref<8x8x1xf32, #tpu.memory_space<vmem>>, vector<1x8x1xf32>
    %300 = vector.shape_cast %299 : vector<1x8x1xf32> to vector<8x1xf32>
    %301 = vector.broadcast %300 : vector<8x1xf32> to vector<8x512xf32>
    %302 = vector.broadcast %0 : vector<1x512xf32> to vector<8x512xf32>
    %303 = arith.mulf %301, %302 : vector<8x512xf32>
    %304 = vector.broadcast %1 : vector<1x512xf32> to vector<8x512xf32>
    %305 = arith.addf %303, %304 : vector<8x512xf32>
    %c0_104 = arith.constant 0 : index
    %c0_105 = arith.constant 0 : index
    %306 = vector.load %arg4[%c0_104, %c0_105] : memref<128x512xf32, #tpu.memory_space<vmem>>, vector<128x512xf32>
    %cst_106 = arith.constant dense<0.000000e+00> : vector<8x512xf32>
    %307 = tpu.matmul %297, %306, %cst_106 {dimension_numbers = #tpu.dot_dimension_numbers<[1], [0], [0], [1], [0, 0, 1, 1], [], []>} : vector<8x128xf32>, vector<128x512xf32>, vector<8x512xf32> -> vector<8x512xf32>
    %308 = arith.addf %305, %307 : vector<8x512xf32>
    %309 = vector.extract_strided_slice %308 {offsets = [0, 0], sizes = [8, 128], strides = [1, 1]} : vector<8x512xf32> to vector<8x128xf32>
    %cst_107 = arith.constant 5.000000e-01 : f32
    %310 = vector.broadcast %cst_107 : f32 to vector<8x128xf32>
    %311 = arith.mulf %310, %309 : vector<8x128xf32>
    %312 = math.tanh %311 : vector<8x128xf32>
    %cst_108 = arith.constant 1.000000e+00 : f32
    %313 = vector.broadcast %cst_108 : f32 to vector<8x128xf32>
    %314 = arith.addf %312, %313 : vector<8x128xf32>
    %cst_109 = arith.constant 5.000000e-01 : f32
    %315 = vector.broadcast %cst_109 : f32 to vector<8x128xf32>
    %316 = arith.mulf %315, %314 : vector<8x128xf32>
    %317 = vector.extract_strided_slice %308 {offsets = [0, 128], sizes = [8, 128], strides = [1, 1]} : vector<8x512xf32> to vector<8x128xf32>
    %cst_110 = arith.constant 5.000000e-01 : f32
    %318 = vector.broadcast %cst_110 : f32 to vector<8x128xf32>
    %319 = arith.mulf %318, %317 : vector<8x128xf32>
    %320 = math.tanh %319 : vector<8x128xf32>
    %cst_111 = arith.constant 1.000000e+00 : f32
    %321 = vector.broadcast %cst_111 : f32 to vector<8x128xf32>
    %322 = arith.addf %320, %321 : vector<8x128xf32>
    %cst_112 = arith.constant 5.000000e-01 : f32
    %323 = vector.broadcast %cst_112 : f32 to vector<8x128xf32>
    %324 = arith.mulf %323, %322 : vector<8x128xf32>
    %325 = vector.extract_strided_slice %308 {offsets = [0, 256], sizes = [8, 128], strides = [1, 1]} : vector<8x512xf32> to vector<8x128xf32>
    %326 = math.tanh %325 : vector<8x128xf32>
    %327 = vector.extract_strided_slice %308 {offsets = [0, 384], sizes = [8, 128], strides = [1, 1]} : vector<8x512xf32> to vector<8x128xf32>
    %cst_113 = arith.constant 5.000000e-01 : f32
    %328 = vector.broadcast %cst_113 : f32 to vector<8x128xf32>
    %329 = arith.mulf %328, %327 : vector<8x128xf32>
    %330 = math.tanh %329 : vector<8x128xf32>
    %cst_114 = arith.constant 1.000000e+00 : f32
    %331 = vector.broadcast %cst_114 : f32 to vector<8x128xf32>
    %332 = arith.addf %330, %331 : vector<8x128xf32>
    %cst_115 = arith.constant 5.000000e-01 : f32
    %333 = vector.broadcast %cst_115 : f32 to vector<8x128xf32>
    %334 = arith.mulf %333, %332 : vector<8x128xf32>
    %335 = arith.mulf %324, %295 : vector<8x128xf32>
    %336 = arith.mulf %316, %326 : vector<8x128xf32>
    %337 = arith.addf %335, %336 : vector<8x128xf32>
    %338 = math.tanh %337 : vector<8x128xf32>
    %339 = arith.mulf %334, %338 : vector<8x128xf32>
    %c8_i32 = arith.constant 8 : i32
    %c0_116 = arith.constant 0 : index
    %c0_117 = arith.constant 0 : index
    %340 = vector.load %arg5[%c0_116, %c0_117] : memref<1x128xf32, #tpu.memory_space<vmem>>, vector<1x128xf32>
    %341 = vector.broadcast %340 : vector<1x128xf32> to vector<8x128xf32>
    %342 = arith.mulf %339, %341 : vector<8x128xf32>
    %cst_118 = arith.constant dense<0.000000e+00> : vector<8xf32>
    %343 = vector.multi_reduction <add>, %342, %cst_118 [1] : vector<8x128xf32> to vector<8xf32>
    %344 = vector.shape_cast %343 : vector<8xf32> to vector<8x1xf32>
    %c0_119 = arith.constant 0 : index
    %c0_120 = arith.constant 0 : index
    %345 = vector.load %arg6[%c0_119, %c0_120] : memref<1x1xf32, #tpu.memory_space<vmem>>, vector<1x1xf32>
    %346 = vector.broadcast %345 : vector<1x1xf32> to vector<8x1xf32>
    %347 = arith.addf %344, %346 : vector<8x1xf32>
    %c0_121 = arith.constant 0 : index
    %c0_122 = arith.constant 0 : index
    %348 = vector.load %arg7[%c0_121, %c0_122] : memref<8x1xf32, #tpu.memory_space<vmem>>, vector<8x1xf32>
    tpu.vector_store %arg7[%c0_121, %c0_122], %347 {strides = array<i32>} : memref<8x1xf32, #tpu.memory_space<vmem>>, vector<8x1xf32>,
    return
  }
  func.func @transform_0(%arg0: i32) -> (i32, i32, i32) {
    %c0_i32 = arith.constant 0 : i32
    %c0_i32_0 = arith.constant 0 : i32
    %c0_i32_1 = arith.constant 0 : i32
    return %c0_i32, %arg0, %c0_i32_0 : i32, i32, i32
  }
  func.func @transform_1(%arg0: i32) -> (i32, i32) {
    %c0_i32 = arith.constant 0 : i32
    %c0_i32_0 = arith.constant 0 : i32
    %c0_i32_1 = arith.constant 0 : i32
    return %c0_i32, %c0_i32_0 : i32, i32
  }
  func.func @transform_2(%arg0: i32) -> (i32, i32) {
    %c0_i32 = arith.constant 0 : i32
    %c0_i32_0 = arith.constant 0 : i32
    %c0_i32_1 = arith.constant 0 : i32
    return %c0_i32, %c0_i32_0 : i32, i32
  }
  func.func @transform_3(%arg0: i32) -> (i32, i32) {
    %c0_i32 = arith.constant 0 : i32
    %c0_i32_0 = arith.constant 0 : i32
    %c0_i32_1 = arith.constant 0 : i32
    return %c0_i32, %c0_i32_0 : i32, i32
  }
  func.func @transform_4(%arg0: i32) -> (i32, i32) {
    %c0_i32 = arith.constant 0 : i32
    %c0_i32_0 = arith.constant 0 : i32
    %c0_i32_1 = arith.constant 0 : i32
    return %c0_i32, %c0_i32_0 : i32, i32
  }
  func.func @transform_5(%arg0: i32) -> (i32, i32) {
    %c0_i32 = arith.constant 0 : i32
    %c0_i32_0 = arith.constant 0 : i32
    %c0_i32_1 = arith.constant 0 : i32
    return %c0_i32, %c0_i32_0 : i32, i32
  }
  func.func @transform_6(%arg0: i32) -> (i32, i32) {
    %c0_i32 = arith.constant 0 : i32
    %c0_i32_0 = arith.constant 0 : i32
    return %arg0, %c0_i32 : i32, i32
  }
}

</mosaic_0001>

<bundles_post_ra>
// kernel: tpu_custom_call.1
= control target key start
LH: loop header
LB: loop body
LE: loop exit
PB: predicated region body
PF: predicated region fallthrough
CT: control target
= control target key end

     0   :  { %s2216_s0 = inlined_call_operand.vmem [shape: f32[8,8,1], index: 0, kind: input, shape index: {}]   ;;  %s2217_s1 = inlined_call_operand.vmem [shape: f32[1,512], index: 1, kind: input, shape index: {}]   ;;  %s2218_s2 = inlined_call_operand.vmem [shape: f32[1,512], index: 2, kind: input, shape index: {}]   ;;  %s2219_s3 = inlined_call_operand.hbm [shape: f32[128,512], index: 3, kind: input, shape index: {}]   ;;  %s2220_s4 = inlined_call_operand.vmem [shape: f32[1,128], index: 4, kind: input, shape index: {}]   ;;  %s2221_s5 = inlined_call_operand.<no memory space> [shape: f32[1,1], index: 5, kind: input, shape index: {}]   ;;  %s2222_s6 = inlined_call_operand.vmem [shape: f32[8,1], index: 6, kind: output, shape index: {}]  }
   0x1   :  { %v11_v0 = vstv %s2221_s5 }
   0x2   :  { %12 = vst [vmem:[#allocation2] sm:$0x1] %v11_v0 }
   0x3   :  { %13 = vsyncpa [#allocation4], 0  ;;  %s24_s25 = sshll.u32 %s2219_s3, 4  ;;  %s1266_s26 = smov [#allocation3]   ;;  %s25_s25 = int_to_ptr.hbm [resolvable:$true] %s24_s25 }
   0x4   :  { %s26_s27 = sshll.u32 %s1266_s26, 4  ;;  %s1267_s28 = smov 512   ;;  %s27_s27 = int_to_ptr.vmem [resolvable:$true] %s26_s27 }
   0x5   :  { %s1268_s29 = smov 32  }
   0x6   :  { %32 = dma.hbm_to_vmem [thread:$0]  %s25_s25, 8192, %s27_s27, [#allocation4], %s1267_s28, %s1267_s28, %s1268_s29  }
   0x7   :  { %1264 = dma.done.wait [#allocation4], 8192  }
   0x8   :  { %1265 = vsyncadd [#allocation4], 4294959104  ;;  %v1269_v1 = vmov 0   ;;  %v1312_v2 = vld [vmem:[#allocation3 + $0x1e0] sm:$0xff]  ;;  %v1314_v3 = vld [vmem:[#allocation3 + $0x1e8] sm:$0xff]  ;;  %vm1072_vm0 = vcmask 7168  }
   0x9   :  { %1091 = vset.pattern.permute.xlu0 %v1269_v1  ;;  %1092 = vset.pattern.permute.xlu1 %v1269_v1  ;;  %v1316_v4 = vld [vmem:[#allocation3 + $0x1f0] sm:$0xff]  ;;  %v1320_v5 = vld [vmem:[#allocation3 + $0x1f8] sm:$0xff]  ;;  %v1322_v6 = vld [vmem:[#allocation3 + $0x1c0] sm:$0xff] }
   0xa   :  { %1093 = vset.pattern.permute.xlu2 %v1269_v1  ;;  %139 = vmatpush.msra.mxu0 %v1312_v2  ;;  %v1324_v7 = vld [vmem:[#allocation3 + $0x1c8] sm:$0xff]  ;;  %v1328_v8 = vld [vmem:[#allocation3 + $0x1d0] sm:$0xff]  ;;  %v1330_v9 = vld [vmem:[#allocation3 + $0x1d8] sm:$0xff] }
   0xb   :  { %159 = vmatpush.msra.mxu1 %v1314_v3  ;;  %179 = vmatpush.msra.mxu2 %v1316_v4  ;;  %v1332_v10 = vld [vmem:[#allocation3 + $0x1a0] sm:$0xff]  ;;  %v1336_v11 = vld [vmem:[#allocation3 + $0x1a8] sm:$0xff]  ;;  %v1338_v12 = vld [vmem:[#allocation3 + $0x1b0] sm:$0xff] }
   0xc   :  { %199 = vmatpush.msra.mxu3 %v1320_v5  ;;  %140 = vmatpush.msra.mxu0 %v1322_v6  ;;  %v1340_v13 = vld [vmem:[#allocation3 + $0x1b8] sm:$0xff]  ;;  %v1344_v14 = vld [vmem:[#allocation3 + $0x180] sm:$0xff]  ;;  %v1346_v15 = vld [vmem:[#allocation3 + $0x188] sm:$0xff] }
   0xd   :  { %160 = vmatpush.msra.mxu1 %v1324_v7  ;;  %180 = vmatpush.msra.mxu2 %v1328_v8  ;;  %v1350_v16 = vld [vmem:[#allocation3 + $0x190] sm:$0xff]  ;;  %v1352_v17 = vld [vmem:[#allocation3 + $0x198] sm:$0xff]  ;;  %v1356_v18 = vld [vmem:[#allocation3 + $0x160] sm:$0xff] }
   0xe   :  { %200 = vmatpush.msra.mxu3 %v1330_v9  ;;  %141 = vmatpush.msra.mxu0 %v1332_v10  ;;  %v1358_v19 = vld [vmem:[#allocation3 + $0x168] sm:$0xff]  ;;  %v1362_v20 = vld [vmem:[#allocation3 + $0x170] sm:$0xff]  ;;  %v1364_v21 = vld [vmem:[#allocation3 + $0x178] sm:$0xff] }
   0xf   :  { %161 = vmatpush.msra.mxu1 %v1336_v11  ;;  %181 = vmatpush.msra.mxu2 %v1338_v12  ;;  %v1368_v22 = vld [vmem:[#allocation3 + $0x140] sm:$0xff]  ;;  %v1370_v23 = vld [vmem:[#allocation3 + $0x148] sm:$0xff]  ;;  %v1374_v24 = vld [vmem:[#allocation3 + $0x150] sm:$0xff] }
  0x10   :  { %201 = vmatpush.msra.mxu3 %v1340_v13  ;;  %142 = vmatpush.msra.mxu0 %v1344_v14  ;;  %v1376_v25 = vld [vmem:[#allocation3 + $0x158] sm:$0xff]  ;;  %v1380_v26 = vld [vmem:[#allocation3 + $0x120] sm:$0xff]  ;;  %v1382_v27 = vld [vmem:[#allocation3 + $0x128] sm:$0xff] }
  0x11   :  { %162 = vmatpush.msra.mxu1 %v1346_v15  ;;  %182 = vmatpush.msra.mxu2 %v1350_v16  ;;  %v1386_v28 = vld [vmem:[#allocation3 + $0x130] sm:$0xff]  ;;  %v1388_v29 = vld [vmem:[#allocation3 + $0x138] sm:$0xff]  ;;  %v1392_v30 = vld [vmem:[#allocation3 + $0x100] sm:$0xff] }
  0x12   :  { %202 = vmatpush.msra.mxu3 %v1352_v17  ;;  %143 = vmatpush.msra.mxu0 %v1356_v18  ;;  %v1394_v31 = vld [vmem:[#allocation3 + $0x108] sm:$0xff]  ;;  %v1398_v32 = vld [vmem:[#allocation3 + $0x110] sm:$0xff]  ;;  %v1400_v33 = vld [vmem:[#allocation3 + $0x118] sm:$0xff] }
  0x13   :  { %163 = vmatpush.msra.mxu1 %v1358_v19  ;;  %183 = vmatpush.msra.mxu2 %v1362_v20  ;;  %v1404_v34 = vld [vmem:[#allocation3 + $0xe0] sm:$0xff]  ;;  %v1406_v35 = vld [vmem:[#allocation3 + $0xe8] sm:$0xff]  ;;  %v1410_v36 = vld [vmem:[#allocation3 + $0xf0] sm:$0xff] }
  0x14   :  { %203 = vmatpush.msra.mxu3 %v1364_v21  ;;  %144 = vmatpush.msra.mxu0 %v1368_v22  ;;  %v1412_v37 = vld [vmem:[#allocation3 + $0xf8] sm:$0xff]  ;;  %v1416_v38 = vld [vmem:[#allocation3 + $0xc0] sm:$0xff]  ;;  %v1418_v39 = vld [vmem:[#allocation3 + $0xc8] sm:$0xff] }
  0x15   :  { %164 = vmatpush.msra.mxu1 %v1370_v23  ;;  %184 = vmatpush.msra.mxu2 %v1374_v24  ;;  %v1422_v40 = vld [vmem:[#allocation3 + $0xd0] sm:$0xff]  ;;  %v1424_v41 = vld [vmem:[#allocation3 + $0xd8] sm:$0xff]  ;;  %v1428_v42 = vld [vmem:[#allocation3 + $0xa0] sm:$0xff] }
  0x16   :  { %204 = vmatpush.msra.mxu3 %v1376_v25  ;;  %145 = vmatpush.msra.mxu0 %v1380_v26  ;;  %v1430_v43 = vld [vmem:[#allocation3 + $0xa8] sm:$0xff]  ;;  %v1434_v44 = vld [vmem:[#allocation3 + $0xb0] sm:$0xff]  ;;  %v1436_v45 = vld [vmem:[#allocation3 + $0xb8] sm:$0xff] }
  0x17   :  { %165 = vmatpush.msra.mxu1 %v1382_v27  ;;  %185 = vmatpush.msra.mxu2 %v1386_v28  ;;  %2330 = vst [vmem:[#allocation6_spill] sm:$0xff] %v1434_v44  ;;  %v1440_v46 = vld [vmem:[#allocation3 + $0x80] sm:$0xff]  ;;  %v1442_v47 = vld [vmem:[#allocation3 + $0x88] sm:$0xff]  ;;  %v1446_v48 = vld [vmem:[#allocation3 + $0x90] sm:$0xff] }
  0x18   :  { %205 = vmatpush.msra.mxu3 %v1388_v29  ;;  %146 = vmatpush.msra.mxu0 %v1392_v30  ;;  %2331 = vst [vmem:[#allocation7_spill] sm:$0xff] %v1436_v45  ;;  %v1448_v49 = vld [vmem:[#allocation3 + $0x98] sm:$0xff]  ;;  %v1455_v51 = vld [vmem:[#allocation3 + $0x60] sm:$0xff]  ;;  %v1459_v52 = vld [vmem:[#allocation3 + $0x68] sm:$0xff] }
  0x19   :  { %166 = vmatpush.msra.mxu1 %v1394_v31  ;;  %186 = vmatpush.msra.mxu2 %v1398_v32  ;;  %2332 = vst [vmem:[#allocation8_spill] sm:$0xff] %v1440_v46  ;;  %v43_v50 = vld [vmem:[%s2216_s0] sm:$0xff]  ;;  %v1461_v53 = vld [vmem:[#allocation3 + $0x70] sm:$0xff]  ;;  %v1470_v56 = vld [vmem:[#allocation3 + $0x48] sm:$0xff] }
  0x1a   :  { %206 = vmatpush.msra.mxu3 %v1400_v33  ;;  %147 = vmatpush.msra.mxu0 %v1404_v34  ;;  %2333 = vst [vmem:[#allocation9_spill] sm:$0xff] %v1442_v47  ;;  %v1465_v54 = vld [vmem:[#allocation3 + $0x78] sm:$0xff]  ;;  %v1467_v55 = vld [vmem:[#allocation3 + $0x40] sm:$0xff]  ;;  %v1472_v57 = vld [vmem:[#allocation3 + $0x50] sm:$0xff] }
  0x1b   :  { %167 = vmatpush.msra.mxu1 %v1406_v35  ;;  %187 = vmatpush.msra.mxu2 %v1410_v36  ;;  %2334 = vst [vmem:[#allocation10_spill] sm:$0xff] %v1446_v48  ;;  %v1476_v58 = vld [vmem:[#allocation3 + $0x58] sm:$0xff]  ;;  %v1478_v59 = vld [vmem:[#allocation3 + $0x20] sm:$0xff]  ;;  %v1482_v60 = vld [vmem:[#allocation3 + $0x28] sm:$0xff] }
  0x1c   :  { %207 = vmatpush.msra.mxu3 %v1412_v37  ;;  %148 = vmatpush.msra.mxu0 %v1416_v38  ;;  %2335 = vst [vmem:[#allocation11_spill] sm:$0xff] %v1448_v49  ;;  %v1484_v61 = vld [vmem:[#allocation3 + $0x30] sm:$0xff]  ;;  %v1488_v62 = vld [vmem:[#allocation3 + $0x38] sm:$0xff]  ;;  %v1490_v63 = vld [vmem:[#allocation3] sm:$0xff] }
  0x1d   :  { %168 = vmatpush.msra.mxu1 %v1418_v39  ;;  %188 = vmatpush.msra.mxu2 %v1422_v40  ;;  %2336 = vst [vmem:[#allocation12_spill] sm:$0xff] %v1455_v51  ;;  %v1494_v0 = vld [vmem:[#allocation3 + $0x8] sm:$0xff]  ;;  %v1496_v1 = vld [vmem:[#allocation3 + $0x10] sm:$0xff] }
  0x1e   :  { %208 = vmatpush.msra.mxu3 %v1424_v41  ;;  %149 = vmatpush.msra.mxu0 %v1428_v42  ;;  %2337 = vst [vmem:[#allocation13_spill] sm:$0xff] %v1459_v52 }
  0x1f   :  { %169 = vmatpush.msra.mxu1 %v1430_v43  ;;  %189 = vmatpush.msra.mxu2 %v1434_v44  ;;  %2338 = vst [vmem:[#allocation14_spill] sm:$0xff] %v1461_v53 }
  0x20   :  { %209 = vmatpush.msra.mxu3 %v1436_v45  ;;  %150 = vmatpush.msra.mxu0 %v1440_v46  ;;  %2339 = vst [vmem:[#allocation15_spill] sm:$0xff] %v1465_v54 }
  0x21   :  { %170 = vmatpush.msra.mxu1 %v1442_v47  ;;  %190 = vmatpush.msra.mxu2 %v1446_v48  ;;  %2340 = vst [vmem:[#allocation16_spill] sm:$0xff] %v1467_v55 }
  0x22   :  { %210 = vmatpush.msra.mxu3 %v1448_v49  ;;  %46 = vperm.xlu0 %1091, %v43_v50   ;;  %2341 = vst [vmem:[#allocation17_spill] sm:$0xff] %v1470_v56  ;;  %v1500_v50 = vld [vmem:[#allocation3 + $0x18] sm:$0xff] }
  0x23   :  { %151 = vmatpush.msra.mxu0 %v1455_v51  ;;  %2342 = vst [vmem:[#allocation18_spill] sm:$0xff] %v1472_v57  ;;  %171 = vmatpush.msra.mxu1 %v1459_v52 }
  0x24   :  { %191 = vmatpush.msra.mxu2 %v1461_v53  ;;  %2343 = vst [vmem:[#allocation19_spill] sm:$0xff] %v1476_v58  ;;  %211 = vmatpush.msra.mxu3 %v1465_v54 }
  0x25   :  { %2344 = vst [vmem:[#allocation20_spill] sm:$0xff] %v1478_v59  ;;  %152 = vmatpush.msra.mxu0 %v1467_v55  ;;  %172 = vmatpush.msra.mxu1 %v1470_v56 }
  0x26   :  { %2345 = vst [vmem:[#allocation21_spill] sm:$0xff] %v1482_v60  ;;  %192 = vmatpush.msra.mxu2 %v1472_v57  ;;  %212 = vmatpush.msra.mxu3 %v1476_v58  ;;  %v1079_v57 = vld [vmem:[%s2216_s0 + $0x8] sm:$0xff] }
  0x27   :  { %2346 = vst [vmem:[#allocation22_spill] sm:$0xff] %v1484_v61  ;;  %153 = vmatpush.msra.mxu0 %v1478_v59  ;;  %173 = vmatpush.msra.mxu1 %v1482_v60  ;;  %v1270_v60 = vmov 0.0  }
  0x28   :  { %2347 = vst [vmem:[#allocation23_spill] sm:$0xff] %v1488_v62  ;;  %193 = vmatpush.msra.mxu2 %v1484_v61  ;;  %213 = vmatpush.msra.mxu3 %v1488_v62 }
  0x29   :  { %2348 = vst [vmem:[#allocation24_spill] sm:$0xff] %v1490_v63  ;;  %154 = vmatpush.msra.mxu0 %v1490_v63  ;;  %174 = vmatpush.msra.mxu1 %v1494_v0 }
  0x2a   :  { %2349 = vst [vmem:[#allocation25_spill] sm:$0xff] %v1494_v0  ;;  %194 = vmatpush.msra.mxu2 %v1496_v1  ;;  %214 = vmatpush.msra.mxu3 %v1500_v50 }
  0x2b   :  { %2350 = vst [vmem:[#allocation26_spill] sm:$0xff] %v1496_v1  ;;  %245 = vperm.xlu0 %1091, %v1079_v57   ;;  %155 = vmatmul.f32.vlgmr.msra.gmra.mxu0 %v1270_v60  ;;  %v1084_v1 = vld [vmem:[%s2216_s0 + $0x30] sm:$0xff]  ;;  %v2352_v57 = vld [vmem:[#allocation18_spill] sm:$0xff] }
  0x2c   :  { %2351 = vst [vmem:[#allocation27_spill] sm:$0xff] %v1500_v50  ;;  %175 = vmatmul.f32.vlgmr.msra.gmra.mxu1 %v1270_v60  ;;  %195 = vmatmul.f32.vlgmr.msra.gmra.mxu2 %v1270_v60 }
  0x2d   :  { %215 = vmatmul.f32.vlgmr.msra.gmra.mxu3 %v1270_v60  ;;  %256 = vmatpush.msrb.mxu0 %v1312_v2  ;;  %v2353_v60 = vld [vmem:[#allocation21_spill] sm:$0xff] }
  0x2e   :  { %276 = vmatpush.msrb.mxu1 %v1314_v3  ;;  %296 = vmatpush.msrb.mxu2 %v1316_v4 }
  0x2f   :  { %316 = vmatpush.msrb.mxu3 %v1320_v5  ;;  %257 = vmatpush.msrb.mxu0 %v1322_v6 }
  0x30   :  { %277 = vmatpush.msrb.mxu1 %v1324_v7  ;;  %297 = vmatpush.msrb.mxu2 %v1328_v8 }
  0x31   :  { %317 = vmatpush.msrb.mxu3 %v1330_v9  ;;  %258 = vmatpush.msrb.mxu0 %v1332_v10 }
  0x32   :  { %278 = vmatpush.msrb.mxu1 %v1336_v11  ;;  %298 = vmatpush.msrb.mxu2 %v1338_v12 }
  0x33   :  { %830 = vperm.xlu0 %1091, %v1084_v1   ;;  %318 = vmatpush.msrb.mxu3 %v1340_v13  ;;  %v2354_v1 = vld [vmem:[#allocation26_spill] sm:$0xff] }
  0x34   :  { %259 = vmatpush.msrb.mxu0 %v1344_v14  ;;  %279 = vmatpush.msrb.mxu1 %v1346_v15 }
  0x35   :  { %299 = vmatpush.msrb.mxu2 %v1350_v16  ;;  %319 = vmatpush.msrb.mxu3 %v1352_v17 }
  0x36   :  { %260 = vmatpush.msrb.mxu0 %v1356_v18  ;;  %280 = vmatpush.msrb.mxu1 %v1358_v19 }
  0x37   :  { %300 = vmatpush.msrb.mxu2 %v1362_v20  ;;  %320 = vmatpush.msrb.mxu3 %v1364_v21 }
  0x38   :  { %261 = vmatpush.msrb.mxu0 %v1368_v22  ;;  %281 = vmatpush.msrb.mxu1 %v1370_v23 }
  0x39   :  { %301 = vmatpush.msrb.mxu2 %v1374_v24  ;;  %321 = vmatpush.msrb.mxu3 %v1376_v25 }
  0x3a   :  { %262 = vmatpush.msrb.mxu0 %v1380_v26  ;;  %282 = vmatpush.msrb.mxu1 %v1382_v27 }
  0x3b   :  { %302 = vmatpush.msrb.mxu2 %v1386_v28  ;;  %322 = vmatpush.msrb.mxu3 %v1388_v29 }
  0x3c   :  { %263 = vmatpush.msrb.mxu0 %v1392_v30  ;;  %283 = vmatpush.msrb.mxu1 %v1394_v31 }
  0x3d   :  { %303 = vmatpush.msrb.mxu2 %v1398_v32  ;;  %323 = vmatpush.msrb.mxu3 %v1400_v33 }
  0x3e   :  { %264 = vmatpush.msrb.mxu0 %v1404_v34  ;;  %284 = vmatpush.msrb.mxu1 %v1406_v35 }
  0x3f   :  { %304 = vmatpush.msrb.mxu2 %v1410_v36  ;;  %324 = vmatpush.msrb.mxu3 %v1412_v37 }
  0x40   :  { %265 = vmatpush.msrb.mxu0 %v1416_v38  ;;  %285 = vmatpush.msrb.mxu1 %v1418_v39 }
  0x41   :  { %305 = vmatpush.msrb.mxu2 %v1422_v40  ;;  %325 = vmatpush.msrb.mxu3 %v1424_v41 }
  0x42   :  { %266 = vmatpush.msrb.mxu0 %v1428_v42  ;;  %286 = vmatpush.msrb.mxu1 %v1430_v43 }
  0x43   :  { %306 = vmatpush.msrb.mxu2 %v1434_v44  ;;  %326 = vmatpush.msrb.mxu3 %v1436_v45 }
  0x44   :  { %267 = vmatpush.msrb.mxu0 %v1440_v46  ;;  %287 = vmatpush.msrb.mxu1 %v1442_v47 }
  0x45   :  { %307 = vmatpush.msrb.mxu2 %v1446_v48  ;;  %327 = vmatpush.msrb.mxu3 %v1448_v49 }
  0x46   :  { %268 = vmatpush.msrb.mxu0 %v1455_v51  ;;  %288 = vmatpush.msrb.mxu1 %v1459_v52 }
  0x47   :  { %308 = vmatpush.msrb.mxu2 %v1461_v53  ;;  %328 = vmatpush.msrb.mxu3 %v1465_v54 }
  0x48   :  { %269 = vmatpush.msrb.mxu0 %v1467_v55  ;;  %289 = vmatpush.msrb.mxu1 %v1470_v56 }
  0x49   :  { %309 = vmatpush.msrb.mxu2 %v2352_v57  ;;  %329 = vmatpush.msrb.mxu3 %v1476_v58 }
  0x4a   :  { %270 = vmatpush.msrb.mxu0 %v1478_v59  ;;  %290 = vmatpush.msrb.mxu1 %v2353_v60 }
  0x4b   :  { %310 = vmatpush.msrb.mxu2 %v1484_v61  ;;  %330 = vmatpush.msrb.mxu3 %v1488_v62 }
  0x4c   :  { %271 = vmatpush.msrb.mxu0 %v1490_v63  ;;  %291 = vmatpush.msrb.mxu1 %v1494_v0 }
  0x4d   :  { %311 = vmatpush.msrb.mxu2 %v2354_v1  ;;  %331 = vmatpush.msrb.mxu3 %v1500_v50 }
  0x4e   :  { %373 = vmatpush.msra.mxu0 %v1312_v2  ;;  %393 = vmatpush.msra.mxu1 %v1314_v3 }
  0x4f   :  { %413 = vmatpush.msra.mxu2 %v1316_v4  ;;  %433 = vmatpush.msra.mxu3 %v1320_v5 }
  0x50   :  { %374 = vmatpush.msra.mxu0 %v1322_v6  ;;  %394 = vmatpush.msra.mxu1 %v1324_v7 }
  0x51   :  { %414 = vmatpush.msra.mxu2 %v1328_v8  ;;  %434 = vmatpush.msra.mxu3 %v1330_v9 }
  0x52   :  { %375 = vmatpush.msra.mxu0 %v1332_v10  ;;  %395 = vmatpush.msra.mxu1 %v1336_v11 }
  0x53   :  { %415 = vmatpush.msra.mxu2 %v1338_v12  ;;  %435 = vmatpush.msra.mxu3 %v1340_v13 }
  0x54   :  { %376 = vmatpush.msra.mxu0 %v1344_v14  ;;  %396 = vmatpush.msra.mxu1 %v1346_v15 }
  0x55   :  { %416 = vmatpush.msra.mxu2 %v1350_v16  ;;  %436 = vmatpush.msra.mxu3 %v1352_v17 }
  0x56   :  { %377 = vmatpush.msra.mxu0 %v1356_v18  ;;  %397 = vmatpush.msra.mxu1 %v1358_v19 }
  0x57   :  { %417 = vmatpush.msra.mxu2 %v1362_v20  ;;  %437 = vmatpush.msra.mxu3 %v1364_v21 }
  0x58   :  { %378 = vmatpush.msra.mxu0 %v1368_v22  ;;  %398 = vmatpush.msra.mxu1 %v1370_v23 }
  0x59   :  { %418 = vmatpush.msra.mxu2 %v1374_v24  ;;  %438 = vmatpush.msra.mxu3 %v1376_v25 }
  0x5a   :  { %379 = vmatpush.msra.mxu0 %v1380_v26  ;;  %399 = vmatpush.msra.mxu1 %v1382_v27 }
  0x5b   :  { %419 = vmatpush.msra.mxu2 %v1386_v28  ;;  %439 = vmatpush.msra.mxu3 %v1388_v29 }
  0x5c   :  { %380 = vmatpush.msra.mxu0 %v1392_v30  ;;  %400 = vmatpush.msra.mxu1 %v1394_v31 }
  0x5d   :  { %420 = vmatpush.msra.mxu2 %v1398_v32  ;;  %440 = vmatpush.msra.mxu3 %v1400_v33 }
  0x5e   :  { %381 = vmatpush.msra.mxu0 %v1404_v34  ;;  %401 = vmatpush.msra.mxu1 %v1406_v35 }
  0x5f   :  { %421 = vmatpush.msra.mxu2 %v1410_v36  ;;  %441 = vmatpush.msra.mxu3 %v1412_v37 }
  0x60   :  { %382 = vmatpush.msra.mxu0 %v1416_v38  ;;  %402 = vmatpush.msra.mxu1 %v1418_v39 }
  0x61   :  { %422 = vmatpush.msra.mxu2 %v1422_v40  ;;  %442 = vmatpush.msra.mxu3 %v1424_v41 }
  0x62   :  { %383 = vmatpush.msra.mxu0 %v1428_v42  ;;  %403 = vmatpush.msra.mxu1 %v1430_v43 }
  0x63   :  { %423 = vmatpush.msra.mxu2 %v1434_v44  ;;  %443 = vmatpush.msra.mxu3 %v1436_v45 }
  0x64   :  { %384 = vmatpush.msra.mxu0 %v1440_v46  ;;  %404 = vmatpush.msra.mxu1 %v1442_v47 }
  0x65   :  { %424 = vmatpush.msra.mxu2 %v1446_v48  ;;  %444 = vmatpush.msra.mxu3 %v1448_v49 }
  0x66   :  { %385 = vmatpush.msra.mxu0 %v1455_v51  ;;  %405 = vmatpush.msra.mxu1 %v1459_v52 }
  0x67   :  { %425 = vmatpush.msra.mxu2 %v1461_v53  ;;  %445 = vmatpush.msra.mxu3 %v1465_v54 }
  0x68   :  { %386 = vmatpush.msra.mxu0 %v1467_v55  ;;  %406 = vmatpush.msra.mxu1 %v1470_v56 }
  0x69   :  { %426 = vmatpush.msra.mxu2 %v2352_v57  ;;  %446 = vmatpush.msra.mxu3 %v1476_v58  ;;  %v41_v58 = vld [vmem:[%s2217_s1] sm:$0xf] }
  0x6a   :  { %387 = vmatpush.msra.mxu0 %v1478_v59  ;;  %407 = vmatpush.msra.mxu1 %v2353_v60  ;;  %v1644_v57 = vperm.slane %v41_v58, 0  ;;  %v1646_v59 = vperm.slane %v41_v58, 1  ;;  %v1659_v55 = vperm.slane %v41_v58, 2  ;;  %v1661_v54 = vperm.slane %v41_v58, 3 }
  0x6b   :  { %427 = vmatpush.msra.mxu2 %v1484_v61  ;;  %447 = vmatpush.msra.mxu3 %v1488_v62  ;;  %v42_v62 = vld [vmem:[%s2218_s2] sm:$0xf] }
  0x6c   :  { %388 = vmatpush.msra.mxu0 %v1490_v63  ;;  %408 = vmatpush.msra.mxu1 %v1494_v0  ;;  %2355 = vst [vmem:[#allocation28_spill] sm:$0xff] %v1644_v57  ;;  %v1652_v0 = vperm.slane %v42_v62, 0  ;;  %v1664_v48 = vperm.slane %v42_v62, 2  ;;  %v1667_v47 = vperm.slane %v42_v62, 3 }
  0x6d   :  { %428 = vmatpush.msra.mxu2 %v2354_v1  ;;  %448 = vmatpush.msra.mxu3 %v1500_v50  ;;  %2356 = vst [vmem:[#allocation29_spill] sm:$0xff] %v1646_v59  ;;  %v1655_v50 = vperm.slane %v42_v62, 1 }
  0x6e   :  { %2357 = vst [vmem:[#allocation30_spill] sm:$0xff] %v1652_v0 }
  0x6f   :  { %2358 = vst [vmem:[#allocation31_spill] sm:$0xff] %v1655_v50 }
  0x70   :  { %2359 = vst [vmem:[#allocation32_spill] sm:$0xff] %v1659_v55 }
  0x71   :  { %2360 = vst [vmem:[#allocation33_spill] sm:$0xff] %v1661_v54 }
  0x72   :  { %2361 = vst [vmem:[#allocation34_spill] sm:$0xff] %v1664_v48 }
  0x94   :  { %v47_v61 = vpop.permute.xlu0 %46 }
  0x95   :  { %v58_v63 = vmul.f32 %v1644_v57, %v47_v61  ;;  %v59_v1 = vmul.f32 %v1646_v59, %v47_v61  ;;  %v60_v57 = vmul.f32 %v1659_v55, %v47_v61  ;;  %v61_v59 = vmul.f32 %v1661_v54, %v47_v61 }
  0x97   :  { %v71_v60 = vadd.f32 %v1652_v0, %v58_v63  ;;  %v72_v56 = vadd.f32 %v1655_v50, %v59_v1  ;;  %v73_v1 = vadd.f32 %v1664_v48, %v60_v57  ;;  %v74_v58 = vadd.f32 %v1667_v47, %v61_v59 }
  0xa8   :  { %v156_v53 = vpop.f32.mrf.mxu0 }
  0xa9   :  { %v176_v52 = vpop.f32.mrf.mxu1  ;;  %v219_v51 = vadd.f32 %v156_v53, %v71_v60 }
  0xaa   :  { %v220_v49 = vadd.f32 %v176_v52, %v72_v56 }
  0xab   :  { %v223_v46 = vmul.f32 0.5, %v219_v51 }
  0xac   :  { %v227_v63 = vmul.f32 0.5, %v220_v49 }
  0xad   :  { %1096 = vtanh.f32 %v223_v46 }
  0xae   :  { %1098 = vtanh.f32 %v227_v63 }
  0xaf   :  { %v196_v50 = vpop.f32.mrf.mxu2 }
  0xb0   :  { %v216_v0 = vpop.f32.mrf.mxu3  ;;  %v221_v53 = vadd.f32 %v196_v50, %v73_v1 }
  0xb1   :  { %v222_v52 = vadd.f32 %v216_v0, %v74_v58  ;;  %v2365_v58 = vld [vmem:[#allocation10_spill] sm:$0xff] }
  0xb2   :  { %1100 = vtanh.f32 %v221_v53  ;;  %v2366_v53 = vld [vmem:[#allocation11_spill] sm:$0xff] }
  0xb3   :  { %v232_v56 = vmul.f32 0.5, %v222_v52  ;;  %v1097_v60 = vpop.eup %1096  ;;  %v2367_v52 = vld [vmem:[#allocation12_spill] sm:$0xff] }
  0xb4   :  { %v1099_v55 = vpop.eup %1098  ;;  %v225_v45 = vadd.f32 1.0, %v1097_v60  ;;  %v2369_v60 = vld [vmem:[#allocation14_spill] sm:$0xff] }
  0xb5   :  { %v229_v61 = vadd.f32 1.0, %v1099_v55  ;;  %1102 = vtanh.f32 %v232_v56  ;;  %v2364_v55 = vld [vmem:[#allocation9_spill] sm:$0xff] }
  0xb6   :  { %v226_v62 = vmul.f32 0.5, %v225_v45  ;;  %v2362_v45 = vld [vmem:[#allocation7_spill] sm:$0xff]  ;;  %v2368_v56 = vld [vmem:[#allocation13_spill] sm:$0xff] }
  0xb7   :  { %v230_v51 = vmul.f32 0.5, %v229_v61  ;;  %v2370_v61 = vld [vmem:[#allocation15_spill] sm:$0xff] }
  0xb8   :  { %v1101_v49 = vpop.eup %1100 }
  0xb9   :  { %v236_v46 = vmul.f32 0.0, %v230_v51  ;;  %v237_v63 = vmul.f32 %v1101_v49, %v226_v62  ;;  %v2371_v62 = vld [vmem:[#allocation16_spill] sm:$0xff]  ;;  %v2372_v51 = vld [vmem:[#allocation17_spill] sm:$0xff]  ;;  %v2373_v49 = vld [vmem:[#allocation18_spill] sm:$0xff] }
  0xbb   :  { %v1103_v54 = vpop.eup %1102  ;;  %v1671_v57 = vadd.f32 %v237_v63, %v236_v46  ;;  %v2374_v46 = vld [vmem:[#allocation19_spill] sm:$0xff]  ;;  %v2375_v63 = vld [vmem:[#allocation20_spill] sm:$0xff] }
  0xbc   :  { %v234_v59 = vadd.f32 1.0, %v1103_v54  ;;  %v2363_v54 = vld [vmem:[#allocation8_spill] sm:$0xff] }
  0xbd   :  { %1104 = vtanh.f32 %v1671_v57 }
  0xbe   :  { %v235_v50 = vmul.f32 0.5, %v234_v59  ;;  %v2376_v59 = vld [vmem:[#allocation21_spill] sm:$0xff] }
  0xc3   :  { %v1105_v0 = vpop.eup %1104 }
  0xc4   :  { %v240_v1 = vmul.f32 %v1105_v0, %v235_v50  ;;  %v2377_v50 = vld [vmem:[#allocation22_spill] sm:$0xff]  ;;  %v2378_v0 = vld [vmem:[#allocation23_spill] sm:$0xff] }
  0xc6   :  { %272 = vmatmul.f32.vlgmr.msrb.gmra.mxu0 %v240_v1  ;;  %292 = vmatmul.f32.vlgmr.msrb.gmra.mxu1 %v240_v1 }
  0xc7   :  { %312 = vmatmul.f32.vlgmr.msrb.gmra.mxu2 %v240_v1  ;;  %332 = vmatmul.f32.vlgmr.msrb.gmra.mxu3 %v240_v1  ;;  %v2379_v1 = vld [vmem:[#allocation24_spill] sm:$0xff] }
  0xc8   :  { %490 = vmatpush.msrb.mxu0 %v1312_v2  ;;  %510 = vmatpush.msrb.mxu1 %v1314_v3 }
  0xc9   :  { %530 = vmatpush.msrb.mxu2 %v1316_v4  ;;  %550 = vmatpush.msrb.mxu3 %v1320_v5 }
  0xca   :  { %491 = vmatpush.msrb.mxu0 %v1322_v6  ;;  %511 = vmatpush.msrb.mxu1 %v1324_v7 }
  0xcb   :  { %531 = vmatpush.msrb.mxu2 %v1328_v8  ;;  %551 = vmatpush.msrb.mxu3 %v1330_v9 }
  0xcc   :  { %492 = vmatpush.msrb.mxu0 %v1332_v10  ;;  %512 = vmatpush.msrb.mxu1 %v1336_v11 }
  0xcd   :  { %532 = vmatpush.msrb.mxu2 %v1338_v12  ;;  %552 = vmatpush.msrb.mxu3 %v1340_v13 }
  0xce   :  { %493 = vmatpush.msrb.mxu0 %v1344_v14  ;;  %513 = vmatpush.msrb.mxu1 %v1346_v15 }
  0xcf   :  { %533 = vmatpush.msrb.mxu2 %v1350_v16  ;;  %553 = vmatpush.msrb.mxu3 %v1352_v17 }
  0xd0   :  { %494 = vmatpush.msrb.mxu0 %v1356_v18  ;;  %514 = vmatpush.msrb.mxu1 %v1358_v19 }
  0xd1   :  { %534 = vmatpush.msrb.mxu2 %v1362_v20  ;;  %554 = vmatpush.msrb.mxu3 %v1364_v21 }
  0xd2   :  { %495 = vmatpush.msrb.mxu0 %v1368_v22  ;;  %515 = vmatpush.msrb.mxu1 %v1370_v23 }
  0xd3   :  { %535 = vmatpush.msrb.mxu2 %v1374_v24  ;;  %555 = vmatpush.msrb.mxu3 %v1376_v25 }
  0xd4   :  { %496 = vmatpush.msrb.mxu0 %v1380_v26  ;;  %516 = vmatpush.msrb.mxu1 %v1382_v27 }
  0xd5   :  { %536 = vmatpush.msrb.mxu2 %v1386_v28  ;;  %556 = vmatpush.msrb.mxu3 %v1388_v29 }
  0xd6   :  { %497 = vmatpush.msrb.mxu0 %v1392_v30  ;;  %517 = vmatpush.msrb.mxu1 %v1394_v31 }
  0xd7   :  { %537 = vmatpush.msrb.mxu2 %v1398_v32  ;;  %557 = vmatpush.msrb.mxu3 %v1400_v33 }
  0xd8   :  { %498 = vmatpush.msrb.mxu0 %v1404_v34  ;;  %518 = vmatpush.msrb.mxu1 %v1406_v35 }
  0xd9   :  { %538 = vmatpush.msrb.mxu2 %v1410_v36  ;;  %558 = vmatpush.msrb.mxu3 %v1412_v37 }
  0xda   :  { %499 = vmatpush.msrb.mxu0 %v1416_v38  ;;  %519 = vmatpush.msrb.mxu1 %v1418_v39 }
  0xdb   :  { %539 = vmatpush.msrb.mxu2 %v1422_v40  ;;  %559 = vmatpush.msrb.mxu3 %v1424_v41 }
  0xdc   :  { %500 = vmatpush.msrb.mxu0 %v1428_v42  ;;  %520 = vmatpush.msrb.mxu1 %v1430_v43 }
  0xdd   :  { %540 = vmatpush.msrb.mxu2 %v1434_v44  ;;  %560 = vmatpush.msrb.mxu3 %v2362_v45 }
  0xde   :  { %501 = vmatpush.msrb.mxu0 %v2363_v54  ;;  %521 = vmatpush.msrb.mxu1 %v2364_v55  ;;  %v2387_v55 = vld [vmem:[#allocation32_spill] sm:$0xff]  ;;  %v2388_v54 = vld [vmem:[#allocation33_spill] sm:$0xff] }
  0xdf   :  { %541 = vmatpush.msrb.mxu2 %v2365_v58  ;;  %561 = vmatpush.msrb.mxu3 %v2366_v53 }
  0xe0   :  { %502 = vmatpush.msrb.mxu0 %v2367_v52  ;;  %522 = vmatpush.msrb.mxu1 %v2368_v56 }
  0xe1   :  { %542 = vmatpush.msrb.mxu2 %v2369_v60  ;;  %562 = vmatpush.msrb.mxu3 %v2370_v61  ;;  %v2380_v60 = vld [vmem:[#allocation25_spill] sm:$0xff]  ;;  %v2381_v61 = vld [vmem:[#allocation26_spill] sm:$0xff] }
  0xe2   :  { %503 = vmatpush.msrb.mxu0 %v2371_v62  ;;  %523 = vmatpush.msrb.mxu1 %v2372_v51  ;;  %v2382_v62 = vld [vmem:[#allocation27_spill] sm:$0xff]  ;;  %v2384_v51 = vld [vmem:[#allocation29_spill] sm:$0xff] }
  0xe3   :  { %543 = vmatpush.msrb.mxu2 %v2373_v49  ;;  %563 = vmatpush.msrb.mxu3 %v2374_v46  ;;  %v1080_v46 = vld [vmem:[%s2216_s0 + $0x10] sm:$0xff] }
  0xe4   :  { %504 = vmatpush.msrb.mxu0 %v2375_v63  ;;  %524 = vmatpush.msrb.mxu1 %v2376_v59  ;;  %v246_v63 = vpop.permute.xlu0 %245  ;;  %v2383_v49 = vld [vmem:[#allocation28_spill] sm:$0xff] }
  0xe5   :  { %544 = vmatpush.msrb.mxu2 %v2377_v50  ;;  %564 = vmatpush.msrb.mxu3 %v2378_v0  ;;  %v248_v59 = vmul.f32 %v246_v63, %v2383_v49  ;;  %v249_v50 = vmul.f32 %v246_v63, %v2384_v51  ;;  %v251_v45 = vmul.f32 %v246_v63, %v2388_v54  ;;  %v1085_v51 = vld [vmem:[%s2216_s0 + $0x38] sm:$0xff] }
  0xe6   :  { %505 = vmatpush.msrb.mxu0 %v2379_v1  ;;  %525 = vmatpush.msrb.mxu1 %v2380_v60  ;;  %v1081_v1 = vld [vmem:[%s2216_s0 + $0x18] sm:$0xff]  ;;  %v2385_v60 = vld [vmem:[#allocation30_spill] sm:$0xff] }
  0xe7   :  { %545 = vmatpush.msrb.mxu2 %v2381_v61  ;;  %565 = vmatpush.msrb.mxu3 %v2382_v62  ;;  %v252_v0 = vadd.f32 %v248_v59, %v2385_v60  ;;  %v2386_v61 = vld [vmem:[#allocation31_spill] sm:$0xff] }
  0xe8   :  { %362 = vperm.xlu1 %1092, %v1080_v46   ;;  %v253_v56 = vadd.f32 %v249_v50, %v2386_v61  ;;  %v250_v46 = vmul.f32 %v246_v63, %v2387_v55  ;;  %v255_v50 = vadd.f32 %v251_v45, %v1667_v47 }
  0xea   :  { %v254_v59 = vadd.f32 %v250_v46, %v1664_v48 }
  0xf0   :  { %479 = vperm.xlu1 %1092, %v1081_v1  }
  0xf8   :  { %947 = vperm.xlu1 %1092, %v1085_v51  }
 0x143   :  { %v273_v62 = vpop.f32.mrf.mxu0  ;;  %v293_v52 = vpop.f32.mrf.mxu1 }
 0x144   :  { %v336_v53 = vadd.f32 %v273_v62, %v252_v0  ;;  %v337_v58 = vadd.f32 %v293_v52, %v253_v56 }
 0x146   :  { %v340_v49 = vmul.f32 0.5, %v336_v53  ;;  %v344_v44 = vmul.f32 0.5, %v337_v58 }
 0x148   :  { %1106 = vtanh.f32 %v340_v49 }
 0x149   :  { %1108 = vtanh.f32 %v344_v44 }
 0x14a   :  { %v313_v1 = vpop.f32.mrf.mxu2  ;;  %v333_v62 = vpop.f32.mrf.mxu3 }
 0x14b   :  { %v338_v52 = vadd.f32 %v313_v1, %v254_v59  ;;  %v339_v56 = vadd.f32 %v333_v62, %v255_v50 }
 0x14d   :  { %1110 = vtanh.f32 %v338_v52  ;;  %v349_v0 = vmul.f32 0.5, %v339_v56 }
 0x14e   :  { %v1107_v63 = vpop.eup %1106 }
 0x14f   :  { %v1109_v54 = vpop.eup %1108  ;;  %v342_v55 = vadd.f32 1.0, %v1107_v63  ;;  %1112 = vtanh.f32 %v349_v0 }
 0x150   :  { %v346_v61 = vadd.f32 1.0, %v1109_v54 }
 0x151   :  { %v343_v53 = vmul.f32 0.5, %v342_v55  ;;  %v2416_v55 = vld [vmem:[#allocation34_spill] sm:$0xff] }
 0x152   :  { %v347_v58 = vmul.f32 0.5, %v346_v61 }
 0x153   :  { %v1111_v49 = vpop.eup %1110 }
 0x154   :  { %v353_v44 = vmul.f32 %v347_v58, %v1671_v57  ;;  %v354_v51 = vmul.f32 %v1111_v49, %v343_v53 }
 0x155   :  { %v1113_v46 = vpop.eup %1112 }
 0x156   :  { %v1756_v48 = vadd.f32 %v354_v51, %v353_v44  ;;  %v351_v45 = vadd.f32 1.0, %v1113_v46 }
 0x158   :  { %1114 = vtanh.f32 %v1756_v48  ;;  %v352_v59 = vmul.f32 0.5, %v351_v45 }
 0x15e   :  { %v1115_v50 = vpop.eup %1114 }
 0x15f   :  { %v357_v1 = vmul.f32 %v1115_v50, %v352_v59 }
 0x161   :  { %389 = vmatmul.f32.vlgmr.msra.gmra.mxu0 %v357_v1  ;;  %409 = vmatmul.f32.vlgmr.msra.gmra.mxu1 %v357_v1 }
 0x162   :  { %429 = vmatmul.f32.vlgmr.msra.gmra.mxu2 %v357_v1  ;;  %449 = vmatmul.f32.vlgmr.msra.gmra.mxu3 %v357_v1 }
 0x163   :  { %607 = vmatpush.msra.mxu0 %v1312_v2  ;;  %627 = vmatpush.msra.mxu1 %v1314_v3  ;;  %v2389_v2 = vld [vmem:[#allocation6_spill] sm:$0xff]  ;;  %v2390_v3 = vld [vmem:[#allocation7_spill] sm:$0xff] }
 0x164   :  { %647 = vmatpush.msra.mxu2 %v1316_v4  ;;  %667 = vmatpush.msra.mxu3 %v1320_v5  ;;  %v2391_v4 = vld [vmem:[#allocation8_spill] sm:$0xff]  ;;  %v2392_v5 = vld [vmem:[#allocation9_spill] sm:$0xff] }
 0x165   :  { %608 = vmatpush.msra.mxu0 %v1322_v6  ;;  %628 = vmatpush.msra.mxu1 %v1324_v7  ;;  %v2393_v6 = vld [vmem:[#allocation10_spill] sm:$0xff]  ;;  %v2394_v7 = vld [vmem:[#allocation11_spill] sm:$0xff] }
 0x166   :  { %648 = vmatpush.msra.mxu2 %v1328_v8  ;;  %668 = vmatpush.msra.mxu3 %v1330_v9  ;;  %v2395_v8 = vld [vmem:[#allocation12_spill] sm:$0xff]  ;;  %v2396_v9 = vld [vmem:[#allocation13_spill] sm:$0xff] }
 0x167   :  { %609 = vmatpush.msra.mxu0 %v1332_v10  ;;  %629 = vmatpush.msra.mxu1 %v1336_v11  ;;  %v2397_v10 = vld [vmem:[#allocation14_spill] sm:$0xff]  ;;  %v2398_v11 = vld [vmem:[#allocation15_spill] sm:$0xff] }
 0x168   :  { %649 = vmatpush.msra.mxu2 %v1338_v12  ;;  %669 = vmatpush.msra.mxu3 %v1340_v13  ;;  %v2399_v12 = vld [vmem:[#allocation16_spill] sm:$0xff]  ;;  %v2400_v13 = vld [vmem:[#allocation17_spill] sm:$0xff] }
 0x169   :  { %610 = vmatpush.msra.mxu0 %v1344_v14  ;;  %630 = vmatpush.msra.mxu1 %v1346_v15  ;;  %v2401_v14 = vld [vmem:[#allocation18_spill] sm:$0xff]  ;;  %v2402_v15 = vld [vmem:[#allocation19_spill] sm:$0xff] }
 0x16a   :  { %650 = vmatpush.msra.mxu2 %v1350_v16  ;;  %670 = vmatpush.msra.mxu3 %v1352_v17  ;;  %v2403_v16 = vld [vmem:[#allocation20_spill] sm:$0xff]  ;;  %v2404_v17 = vld [vmem:[#allocation21_spill] sm:$0xff] }
 0x16b   :  { %611 = vmatpush.msra.mxu0 %v1356_v18  ;;  %631 = vmatpush.msra.mxu1 %v1358_v19  ;;  %v2405_v18 = vld [vmem:[#allocation22_spill] sm:$0xff]  ;;  %v2406_v19 = vld [vmem:[#allocation23_spill] sm:$0xff] }
 0x16c   :  { %651 = vmatpush.msra.mxu2 %v1362_v20  ;;  %671 = vmatpush.msra.mxu3 %v1364_v21  ;;  %v2407_v20 = vld [vmem:[#allocation24_spill] sm:$0xff]  ;;  %v2408_v21 = vld [vmem:[#allocation25_spill] sm:$0xff] }
 0x16d   :  { %612 = vmatpush.msra.mxu0 %v1368_v22  ;;  %632 = vmatpush.msra.mxu1 %v1370_v23  ;;  %v2409_v22 = vld [vmem:[#allocation26_spill] sm:$0xff]  ;;  %v2410_v23 = vld [vmem:[#allocation27_spill] sm:$0xff] }
 0x16e   :  { %652 = vmatpush.msra.mxu2 %v1374_v24  ;;  %672 = vmatpush.msra.mxu3 %v1376_v25  ;;  %v363_v24 = vpop.permute.xlu1 %362  ;;  %v2411_v25 = vld [vmem:[#allocation28_spill] sm:$0xff] }
 0x16f   :  { %613 = vmatpush.msra.mxu0 %v1380_v26  ;;  %633 = vmatpush.msra.mxu1 %v1382_v27  ;;  %v365_v26 = vmul.f32 %v363_v24, %v2411_v25  ;;  %v2412_v27 = vld [vmem:[#allocation29_spill] sm:$0xff] }
 0x170   :  { %653 = vmatpush.msra.mxu2 %v1386_v28  ;;  %673 = vmatpush.msra.mxu3 %v1388_v29  ;;  %v366_v28 = vmul.f32 %v363_v24, %v2412_v27 }
 0x171   :  { %614 = vmatpush.msra.mxu0 %v1392_v30  ;;  %634 = vmatpush.msra.mxu1 %v1394_v31  ;;  %v369_v29 = vadd.f32 %v365_v26, %v2385_v60  ;;  %v2413_v30 = vld [vmem:[#allocation31_spill] sm:$0xff] }
 0x172   :  { %654 = vmatpush.msra.mxu2 %v1398_v32  ;;  %674 = vmatpush.msra.mxu3 %v1400_v33  ;;  %v370_v31 = vadd.f32 %v366_v28, %v2413_v30 }
 0x173   :  { %615 = vmatpush.msra.mxu0 %v1404_v34  ;;  %635 = vmatpush.msra.mxu1 %v1406_v35 }
 0x174   :  { %655 = vmatpush.msra.mxu2 %v1410_v36  ;;  %675 = vmatpush.msra.mxu3 %v1412_v37  ;;  %v2414_v36 = vld [vmem:[#allocation32_spill] sm:$0xff] }
 0x175   :  { %616 = vmatpush.msra.mxu0 %v1416_v38  ;;  %636 = vmatpush.msra.mxu1 %v1418_v39  ;;  %v367_v37 = vmul.f32 %v363_v24, %v2414_v36  ;;  %v2415_v38 = vld [vmem:[#allocation33_spill] sm:$0xff] }
 0x176   :  { %656 = vmatpush.msra.mxu2 %v1422_v40  ;;  %676 = vmatpush.msra.mxu3 %v1424_v41  ;;  %v368_v39 = vmul.f32 %v363_v24, %v2415_v38 }
 0x177   :  { %617 = vmatpush.msra.mxu0 %v1428_v42  ;;  %637 = vmatpush.msra.mxu1 %v1430_v43  ;;  %v371_v61 = vadd.f32 %v367_v37, %v2416_v55  ;;  %v1847_v37 = vld [vmem:[#allocation3 + $0x1c0] sm:$0xff] }
 0x178   :  { %657 = vmatpush.msra.mxu2 %v2389_v2  ;;  %677 = vmatpush.msra.mxu3 %v2390_v3  ;;  %v372_v62 = vadd.f32 %v368_v39, %v1667_v47  ;;  %v1850_v39 = vld [vmem:[#allocation3 + $0x1c8] sm:$0xff] }
 0x179   :  { %618 = vmatpush.msra.mxu0 %v2391_v4  ;;  %638 = vmatpush.msra.mxu1 %v2392_v5 }
 0x17a   :  { %658 = vmatpush.msra.mxu2 %v2393_v6  ;;  %678 = vmatpush.msra.mxu3 %v2394_v7 }
 0x17b   :  { %619 = vmatpush.msra.mxu0 %v2395_v8  ;;  %639 = vmatpush.msra.mxu1 %v2396_v9 }
 0x17c   :  { %659 = vmatpush.msra.mxu2 %v2397_v10  ;;  %679 = vmatpush.msra.mxu3 %v2398_v11 }
 0x17d   :  { %620 = vmatpush.msra.mxu0 %v2399_v12  ;;  %640 = vmatpush.msra.mxu1 %v2400_v13 }
 0x17e   :  { %660 = vmatpush.msra.mxu2 %v2401_v14  ;;  %680 = vmatpush.msra.mxu3 %v2402_v15 }
 0x17f   :  { %621 = vmatpush.msra.mxu0 %v2403_v16  ;;  %641 = vmatpush.msra.mxu1 %v2404_v17 }
 0x180   :  { %661 = vmatpush.msra.mxu2 %v2405_v18  ;;  %681 = vmatpush.msra.mxu3 %v2406_v19 }
 0x181   :  { %622 = vmatpush.msra.mxu0 %v2407_v20  ;;  %642 = vmatpush.msra.mxu1 %v2408_v21 }
 0x182   :  { %662 = vmatpush.msra.mxu2 %v2409_v22  ;;  %682 = vmatpush.msra.mxu3 %v2410_v23 }
 0x1de   :  { %v390_v32 = vpop.f32.mrf.mxu0  ;;  %v410_v33 = vpop.f32.mrf.mxu1 }
 0x1df   :  { %v453_v34 = vadd.f32 %v390_v32, %v369_v29  ;;  %v454_v35 = vadd.f32 %v410_v33, %v370_v31  ;;  %v1835_v33 = vld [vmem:[#allocation3 + $0x1e0] sm:$0xff] }
 0x1e1   :  { %v457_v57 = vmul.f32 0.5, %v453_v34  ;;  %v461_v54 = vmul.f32 0.5, %v454_v35  ;;  %v1838_v34 = vld [vmem:[#allocation3 + $0x1e8] sm:$0xff]  ;;  %v1844_v35 = vld [vmem:[#allocation3 + $0x1f8] sm:$0xff] }
 0x1e3   :  { %1116 = vtanh.f32 %v457_v57  ;;  %v1853_v57 = vld [vmem:[#allocation3 + $0x1d0] sm:$0xff] }
 0x1e4   :  { %1118 = vtanh.f32 %v461_v54  ;;  %v1856_v54 = vld [vmem:[#allocation3 + $0x1d8] sm:$0xff] }
 0x1e5   :  { %v430_v52 = vpop.f32.mrf.mxu2  ;;  %v450_v56 = vpop.f32.mrf.mxu3 }
 0x1e6   :  { %v455_v0 = vadd.f32 %v430_v52, %v371_v61  ;;  %v456_v63 = vadd.f32 %v450_v56, %v372_v62  ;;  %v1859_v61 = vld [vmem:[#allocation3 + $0x1a0] sm:$0xff]  ;;  %v1862_v62 = vld [vmem:[#allocation3 + $0x1a8] sm:$0xff]  ;;  %v1865_v52 = vld [vmem:[#allocation3 + $0x1b0] sm:$0xff] }
 0x1e7   :  { %v1868_v56 = vld [vmem:[#allocation3 + $0x1b8] sm:$0xff] }
 0x1e8   :  { %1120 = vtanh.f32 %v455_v0  ;;  %v466_v53 = vmul.f32 0.5, %v456_v63  ;;  %v1871_v0 = vld [vmem:[#allocation3 + $0x180] sm:$0xff]  ;;  %v1874_v63 = vld [vmem:[#allocation3 + $0x188] sm:$0xff] }
 0x1e9   :  { %v1117_v58 = vpop.eup %1116 }
 0x1ea   :  { %v1119_v49 = vpop.eup %1118  ;;  %v459_v44 = vadd.f32 1.0, %v1117_v58  ;;  %1122 = vtanh.f32 %v466_v53  ;;  %v1877_v53 = vld [vmem:[#allocation3 + $0x190] sm:$0xff]  ;;  %v1880_v58 = vld [vmem:[#allocation3 + $0x198] sm:$0xff] }
 0x1eb   :  { %v463_v51 = vadd.f32 1.0, %v1119_v49  ;;  %v1883_v49 = vld [vmem:[#allocation3 + $0x160] sm:$0xff] }
 0x1ec   :  { %v460_v46 = vmul.f32 0.5, %v459_v44  ;;  %v1886_v44 = vld [vmem:[#allocation3 + $0x168] sm:$0xff] }
 0x1ed   :  { %v464_v45 = vmul.f32 0.5, %v463_v51  ;;  %v1889_v51 = vld [vmem:[#allocation3 + $0x170] sm:$0xff] }
 0x1ee   :  { %v1121_v59 = vpop.eup %1120 }
 0x1ef   :  { %v470_v50 = vmul.f32 %v464_v45, %v1756_v48  ;;  %v471_v1 = vmul.f32 %v1121_v59, %v460_v46  ;;  %v1841_v48 = vld [vmem:[#allocation3 + $0x1f0] sm:$0xff]  ;;  %v1892_v46 = vld [vmem:[#allocation3 + $0x178] sm:$0xff]  ;;  %v1895_v45 = vld [vmem:[#allocation3 + $0x140] sm:$0xff] }
 0x1f0   :  { %v1123_v24 = vpop.eup %1122  ;;  %v1898_v59 = vld [vmem:[#allocation3 + $0x148] sm:$0xff] }
 0x1f1   :  { %v1832_v26 = vadd.f32 %v471_v1, %v470_v50  ;;  %v468_v28 = vadd.f32 1.0, %v1123_v24  ;;  %v1901_v50 = vld [vmem:[#allocation3 + $0x150] sm:$0xff]  ;;  %v1904_v1 = vld [vmem:[#allocation3 + $0x158] sm:$0xff]  ;;  %v1907_v24 = vld [vmem:[#allocation3 + $0x120] sm:$0xff] }
 0x1f2   :  { %2417 = vst [vmem:[#allocation6_spill] sm:$0xff] %v1904_v1 }
 0x1f3   :  { %1124 = vtanh.f32 %v1832_v26  ;;  %v469_v29 = vmul.f32 0.5, %v468_v28  ;;  %2418 = vst [vmem:[#allocation7_spill] sm:$0xff] %v1907_v24  ;;  %v1910_v28 = vld [vmem:[#allocation3 + $0x128] sm:$0xff] }
 0x1f4   :  { %2419 = vst [vmem:[#allocation8_spill] sm:$0xff] %v1910_v28 }
 0x1f9   :  { %v1125_v31 = vpop.eup %1124 }
 0x1fa   :  { %v474_v32 = vmul.f32 %v1125_v31, %v469_v29  ;;  %v1913_v29 = vld [vmem:[#allocation3 + $0x130] sm:$0xff]  ;;  %v1916_v31 = vld [vmem:[#allocation3 + $0x138] sm:$0xff] }
 0x1fb   :  { %2420 = vst [vmem:[#allocation9_spill] sm:$0xff] %v1913_v29 }
 0x1fc   :  { %506 = vmatmul.f32.vlgmr.msrb.gmra.mxu0 %v474_v32  ;;  %526 = vmatmul.f32.vlgmr.msrb.gmra.mxu1 %v474_v32  ;;  %2421 = vst [vmem:[#allocation10_spill] sm:$0xff] %v1916_v31 }
 0x1fd   :  { %546 = vmatmul.f32.vlgmr.msrb.gmra.mxu2 %v474_v32  ;;  %566 = vmatmul.f32.vlgmr.msrb.gmra.mxu3 %v474_v32  ;;  %v1919_v32 = vld [vmem:[#allocation3 + $0x100] sm:$0xff] }
 0x1fe   :  { %724 = vmatpush.msrb.mxu0 %v1835_v33  ;;  %744 = vmatpush.msrb.mxu1 %v1838_v34  ;;  %2422 = vst [vmem:[#allocation11_spill] sm:$0xff] %v1919_v32 }
 0x1ff   :  { %764 = vmatpush.msrb.mxu2 %v1841_v48  ;;  %784 = vmatpush.msrb.mxu3 %v1844_v35 }
 0x200   :  { %725 = vmatpush.msrb.mxu0 %v1847_v37  ;;  %745 = vmatpush.msrb.mxu1 %v1850_v39 }
 0x201   :  { %765 = vmatpush.msrb.mxu2 %v1853_v57  ;;  %785 = vmatpush.msrb.mxu3 %v1856_v54 }
 0x202   :  { %726 = vmatpush.msrb.mxu0 %v1859_v61  ;;  %746 = vmatpush.msrb.mxu1 %v1862_v62 }
 0x203   :  { %766 = vmatpush.msrb.mxu2 %v1865_v52  ;;  %786 = vmatpush.msrb.mxu3 %v1868_v56 }
 0x204   :  { %727 = vmatpush.msrb.mxu0 %v1871_v0  ;;  %747 = vmatpush.msrb.mxu1 %v1874_v63 }
 0x205   :  { %767 = vmatpush.msrb.mxu2 %v1877_v53  ;;  %787 = vmatpush.msrb.mxu3 %v1880_v58 }
 0x206   :  { %728 = vmatpush.msrb.mxu0 %v1883_v49  ;;  %748 = vmatpush.msrb.mxu1 %v1886_v44 }
 0x207   :  { %768 = vmatpush.msrb.mxu2 %v1889_v51  ;;  %788 = vmatpush.msrb.mxu3 %v1892_v46 }
 0x208   :  { %729 = vmatpush.msrb.mxu0 %v1895_v45  ;;  %749 = vmatpush.msrb.mxu1 %v1898_v59 }
 0x209   :  { %769 = vmatpush.msrb.mxu2 %v1901_v50  ;;  %789 = vmatpush.msrb.mxu3 %v1904_v1  ;;  %v1922_v1 = vld [vmem:[#allocation3 + $0x108] sm:$0xff] }
 0x20a   :  { %730 = vmatpush.msrb.mxu0 %v1907_v24  ;;  %750 = vmatpush.msrb.mxu1 %v1910_v28  ;;  %2423 = vst [vmem:[#allocation12_spill] sm:$0xff] %v1922_v1  ;;  %v1925_v24 = vld [vmem:[#allocation3 + $0x110] sm:$0xff]  ;;  %v1928_v28 = vld [vmem:[#allocation3 + $0x118] sm:$0xff] }
 0x20b   :  { %770 = vmatpush.msrb.mxu2 %v1913_v29  ;;  %790 = vmatpush.msrb.mxu3 %v1916_v31  ;;  %2424 = vst [vmem:[#allocation13_spill] sm:$0xff] %v1925_v24  ;;  %v1931_v29 = vld [vmem:[#allocation3 + $0xe0] sm:$0xff]  ;;  %v1934_v31 = vld [vmem:[#allocation3 + $0xe8] sm:$0xff] }
 0x20c   :  { %731 = vmatpush.msrb.mxu0 %v1919_v32  ;;  %751 = vmatpush.msrb.mxu1 %v1922_v1  ;;  %2425 = vst [vmem:[#allocation14_spill] sm:$0xff] %v1928_v28  ;;  %v1937_v32 = vld [vmem:[#allocation3 + $0xf0] sm:$0xff]  ;;  %v1940_v1 = vld [vmem:[#allocation3 + $0xf8] sm:$0xff] }
 0x20d   :  { %771 = vmatpush.msrb.mxu2 %v1925_v24  ;;  %791 = vmatpush.msrb.mxu3 %v1928_v28  ;;  %v1943_v24 = vld [vmem:[#allocation3 + $0xc0] sm:$0xff]  ;;  %v1946_v28 = vld [vmem:[#allocation3 + $0xc8] sm:$0xff] }
 0x20e   :  { %732 = vmatpush.msrb.mxu0 %v1931_v29  ;;  %752 = vmatpush.msrb.mxu1 %v1934_v31 }
 0x20f   :  { %772 = vmatpush.msrb.mxu2 %v1937_v32  ;;  %792 = vmatpush.msrb.mxu3 %v1940_v1 }
 0x210   :  { %733 = vmatpush.msrb.mxu0 %v1943_v24  ;;  %753 = vmatpush.msrb.mxu1 %v1946_v28 }
 0x211   :  { %773 = vmatpush.msrb.mxu2 %v1422_v40  ;;  %793 = vmatpush.msrb.mxu3 %v1424_v41  ;;  %v480_v40 = vpop.permute.xlu1 %479 }
 0x212   :  { %734 = vmatpush.msrb.mxu0 %v1428_v42  ;;  %754 = vmatpush.msrb.mxu1 %v1430_v43  ;;  %v482_v41 = vmul.f32 %v480_v40, %v2411_v25  ;;  %v483_v42 = vmul.f32 %v480_v40, %v2412_v27 }
 0x213   :  { %774 = vmatpush.msrb.mxu2 %v2389_v2  ;;  %794 = vmatpush.msrb.mxu3 %v2390_v3  ;;  %v1082_v3 = vld [vmem:[%s2216_s0 + $0x20] sm:$0xff] }
 0x214   :  { %735 = vmatpush.msrb.mxu0 %v2391_v4  ;;  %755 = vmatpush.msrb.mxu1 %v2392_v5  ;;  %v486_v43 = vadd.f32 %v482_v41, %v2385_v60  ;;  %v487_v2 = vadd.f32 %v483_v42, %v2413_v30 }
 0x215   :  { %775 = vmatpush.msrb.mxu2 %v2393_v6  ;;  %795 = vmatpush.msrb.mxu3 %v2394_v7 }
 0x216   :  { %736 = vmatpush.msrb.mxu0 %v2395_v8  ;;  %756 = vmatpush.msrb.mxu1 %v2396_v9  ;;  %v484_v8 = vmul.f32 %v480_v40, %v2414_v36  ;;  %v485_v9 = vmul.f32 %v480_v40, %v2415_v38 }
 0x217   :  { %776 = vmatpush.msrb.mxu2 %v2397_v10  ;;  %796 = vmatpush.msrb.mxu3 %v2398_v11 }
 0x218   :  { %737 = vmatpush.msrb.mxu0 %v2399_v12  ;;  %757 = vmatpush.msrb.mxu1 %v2400_v13  ;;  %v1083_v12 = vld [vmem:[%s2216_s0 + $0x28] sm:$0xff]  ;;  %v488_v13 = vadd.f32 %v484_v8, %v2416_v55 }
 0x219   :  { %777 = vmatpush.msrb.mxu2 %v2401_v14  ;;  %797 = vmatpush.msrb.mxu3 %v2402_v15  ;;  %v489_v14 = vadd.f32 %v485_v9, %v1667_v47  ;;  %v2427_v9 = vld [vmem:[#allocation7_spill] sm:$0xff] }
 0x21a   :  { %738 = vmatpush.msrb.mxu0 %v2403_v16  ;;  %758 = vmatpush.msrb.mxu1 %v2404_v17 }
 0x21b   :  { %778 = vmatpush.msrb.mxu2 %v2405_v18  ;;  %798 = vmatpush.msrb.mxu3 %v2406_v19 }
 0x21c   :  { %739 = vmatpush.msrb.mxu0 %v2407_v20  ;;  %759 = vmatpush.msrb.mxu1 %v2408_v21 }
 0x21d   :  { %779 = vmatpush.msrb.mxu2 %v2409_v22  ;;  %799 = vmatpush.msrb.mxu3 %v2410_v23 }
 0x21e   :  { %596 = vperm.xlu2 %1093, %v1082_v3  }
 0x226   :  { %713 = vperm.xlu2 %1093, %v1083_v12   ;;  %v2430_v12 = vld [vmem:[#allocation10_spill] sm:$0xff] }
 0x279   :  { %v507_v4 = vpop.f32.mrf.mxu0  ;;  %v527_v5 = vpop.f32.mrf.mxu1 }
 0x27a   :  { %v570_v6 = vadd.f32 %v507_v4, %v486_v43  ;;  %v571_v7 = vadd.f32 %v527_v5, %v487_v2 }
 0x27c   :  { %v574_v10 = vmul.f32 0.5, %v570_v6  ;;  %v578_v11 = vmul.f32 0.5, %v571_v7 }
 0x27e   :  { %1126 = vtanh.f32 %v574_v10  ;;  %v2428_v10 = vld [vmem:[#allocation8_spill] sm:$0xff] }
 0x27f   :  { %1128 = vtanh.f32 %v578_v11  ;;  %v2429_v11 = vld [vmem:[#allocation9_spill] sm:$0xff] }
 0x280   :  { %v547_v15 = vpop.f32.mrf.mxu2  ;;  %v567_v16 = vpop.f32.mrf.mxu3 }
 0x281   :  { %v572_v17 = vadd.f32 %v547_v15, %v488_v13  ;;  %v573_v18 = vadd.f32 %v567_v16, %v489_v14  ;;  %v2431_v13 = vld [vmem:[#allocation11_spill] sm:$0xff]  ;;  %v2432_v14 = vld [vmem:[#allocation12_spill] sm:$0xff]  ;;  %v2433_v15 = vld [vmem:[#allocation13_spill] sm:$0xff] }
 0x282   :  { %v2434_v16 = vld [vmem:[#allocation14_spill] sm:$0xff] }
 0x283   :  { %1130 = vtanh.f32 %v572_v17  ;;  %v583_v19 = vmul.f32 0.5, %v573_v18  ;;  %v2031_v17 = vld [vmem:[#allocation3 + $0xd0] sm:$0xff]  ;;  %v2034_v18 = vld [vmem:[#allocation3 + $0xd8] sm:$0xff] }
 0x284   :  { %v1127_v20 = vpop.eup %1126 }
 0x285   :  { %v1129_v21 = vpop.eup %1128  ;;  %v576_v22 = vadd.f32 1.0, %v1127_v20  ;;  %1132 = vtanh.f32 %v583_v19  ;;  %v2037_v19 = vld [vmem:[#allocation3 + $0xa0] sm:$0xff]  ;;  %v2040_v20 = vld [vmem:[#allocation3 + $0xa8] sm:$0xff] }
 0x286   :  { %v580_v23 = vadd.f32 1.0, %v1129_v21  ;;  %2435 = vst [vmem:[#allocation15_spill] sm:$0xff] %v2040_v20  ;;  %v2043_v21 = vld [vmem:[#allocation3 + $0xb0] sm:$0xff] }
 0x287   :  { %v577_v40 = vmul.f32 0.5, %v576_v22  ;;  %2436 = vst [vmem:[#allocation16_spill] sm:$0xff] %v2043_v21  ;;  %v2046_v22 = vld [vmem:[#allocation3 + $0xb8] sm:$0xff] }
 0x288   :  { %v581_v41 = vmul.f32 0.5, %v580_v23  ;;  %2437 = vst [vmem:[#allocation17_spill] sm:$0xff] %v2046_v22  ;;  %v2049_v23 = vld [vmem:[#allocation3 + $0x80] sm:$0xff] }
 0x289   :  { %v1131_v42 = vpop.eup %1130  ;;  %2438 = vst [vmem:[#allocation18_spill] sm:$0xff] %v2049_v23 }
 0x28a   :  { %v587_v43 = vmul.f32 %v581_v41, %v1832_v26  ;;  %v588_v2 = vmul.f32 %v1131_v42, %v577_v40  ;;  %v2426_v26 = vld [vmem:[#allocation6_spill] sm:$0xff]  ;;  %v2052_v40 = vld [vmem:[#allocation3 + $0x88] sm:$0xff]  ;;  %v2055_v41 = vld [vmem:[#allocation3 + $0x90] sm:$0xff] }
 0x28b   :  { %v1133_v3 = vpop.eup %1132  ;;  %2439 = vst [vmem:[#allocation19_spill] sm:$0xff] %v2052_v40  ;;  %v2058_v42 = vld [vmem:[#allocation3 + $0x98] sm:$0xff] }
 0x28c   :  { %v1990_v4 = vadd.f32 %v588_v2, %v587_v43  ;;  %v585_v5 = vadd.f32 1.0, %v1133_v3  ;;  %2440 = vst [vmem:[#allocation20_spill] sm:$0xff] %v2055_v41  ;;  %v2061_v43 = vld [vmem:[#allocation3 + $0x60] sm:$0xff]  ;;  %v2064_v2 = vld [vmem:[#allocation3 + $0x68] sm:$0xff]  ;;  %v2067_v3 = vld [vmem:[#allocation3 + $0x70] sm:$0xff] }
 0x28d   :  { %2441 = vst [vmem:[#allocation21_spill] sm:$0xff] %v2058_v42 }
 0x28e   :  { %1134 = vtanh.f32 %v1990_v4  ;;  %v586_v6 = vmul.f32 0.5, %v585_v5  ;;  %2442 = vst [vmem:[#allocation22_spill] sm:$0xff] %v2061_v43  ;;  %v2070_v5 = vld [vmem:[#allocation3 + $0x78] sm:$0xff] }
 0x28f   :  { %2443 = vst [vmem:[#allocation23_spill] sm:$0xff] %v2064_v2 }
 0x290   :  { %2444 = vst [vmem:[#allocation24_spill] sm:$0xff] %v2067_v3 }
 0x291   :  { %2445 = vst [vmem:[#allocation25_spill] sm:$0xff] %v2070_v5 }
 0x294   :  { %v1135_v7 = vpop.eup %1134 }
 0x295   :  { %v591_v8 = vmul.f32 %v1135_v7, %v586_v6  ;;  %v2073_v6 = vld [vmem:[#allocation3 + $0x40] sm:$0xff]  ;;  %v2076_v7 = vld [vmem:[#allocation3 + $0x48] sm:$0xff] }
 0x296   :  { %2446 = vst [vmem:[#allocation26_spill] sm:$0xff] %v2073_v6 }
 0x297   :  { %623 = vmatmul.f32.vlgmr.msra.gmra.mxu0 %v591_v8  ;;  %643 = vmatmul.f32.vlgmr.msra.gmra.mxu1 %v591_v8  ;;  %2447 = vst [vmem:[#allocation27_spill] sm:$0xff] %v2076_v7 }
 0x298   :  { %663 = vmatmul.f32.vlgmr.msra.gmra.mxu2 %v591_v8  ;;  %683 = vmatmul.f32.vlgmr.msra.gmra.mxu3 %v591_v8  ;;  %v2079_v8 = vld [vmem:[#allocation3 + $0x50] sm:$0xff] }
 0x299   :  { %841 = vmatpush.msra.mxu0 %v1835_v33  ;;  %861 = vmatpush.msra.mxu1 %v1838_v34  ;;  %2448 = vst [vmem:[#allocation32_spill] sm:$0xff] %v2079_v8 }
 0x29a   :  { %881 = vmatpush.msra.mxu2 %v1841_v48  ;;  %901 = vmatpush.msra.mxu3 %v1844_v35 }
 0x29b   :  { %842 = vmatpush.msra.mxu0 %v1847_v37  ;;  %862 = vmatpush.msra.mxu1 %v1850_v39 }
 0x29c   :  { %882 = vmatpush.msra.mxu2 %v1853_v57  ;;  %902 = vmatpush.msra.mxu3 %v1856_v54 }
 0x29d   :  { %843 = vmatpush.msra.mxu0 %v1859_v61  ;;  %863 = vmatpush.msra.mxu1 %v1862_v62 }
 0x29e   :  { %883 = vmatpush.msra.mxu2 %v1865_v52  ;;  %903 = vmatpush.msra.mxu3 %v1868_v56 }
 0x29f   :  { %844 = vmatpush.msra.mxu0 %v1871_v0  ;;  %864 = vmatpush.msra.mxu1 %v1874_v63 }
 0x2a0   :  { %884 = vmatpush.msra.mxu2 %v1877_v53  ;;  %904 = vmatpush.msra.mxu3 %v1880_v58 }
 0x2a1   :  { %845 = vmatpush.msra.mxu0 %v1883_v49  ;;  %865 = vmatpush.msra.mxu1 %v1886_v44 }
 0x2a2   :  { %885 = vmatpush.msra.mxu2 %v1889_v51  ;;  %905 = vmatpush.msra.mxu3 %v1892_v46 }
 0x2a3   :  { %846 = vmatpush.msra.mxu0 %v1895_v45  ;;  %866 = vmatpush.msra.mxu1 %v1898_v59 }
 0x2a4   :  { %886 = vmatpush.msra.mxu2 %v1901_v50  ;;  %906 = vmatpush.msra.mxu3 %v2426_v26 }
 0x2a5   :  { %847 = vmatpush.msra.mxu0 %v2427_v9  ;;  %867 = vmatpush.msra.mxu1 %v2428_v10 }
 0x2a6   :  { %887 = vmatpush.msra.mxu2 %v2429_v11  ;;  %907 = vmatpush.msra.mxu3 %v2430_v12 }
 0x2a7   :  { %848 = vmatpush.msra.mxu0 %v2431_v13  ;;  %868 = vmatpush.msra.mxu1 %v2432_v14 }
 0x2a8   :  { %888 = vmatpush.msra.mxu2 %v2433_v15  ;;  %908 = vmatpush.msra.mxu3 %v2434_v16 }
 0x2a9   :  { %849 = vmatpush.msra.mxu0 %v1931_v29  ;;  %869 = vmatpush.msra.mxu1 %v1934_v31 }
 0x2aa   :  { %889 = vmatpush.msra.mxu2 %v1937_v32  ;;  %909 = vmatpush.msra.mxu3 %v1940_v1 }
 0x2ab   :  { %850 = vmatpush.msra.mxu0 %v1943_v24  ;;  %870 = vmatpush.msra.mxu1 %v1946_v28 }
 0x2ac   :  { %890 = vmatpush.msra.mxu2 %v2031_v17  ;;  %910 = vmatpush.msra.mxu3 %v2034_v18 }
 0x2ad   :  { %851 = vmatpush.msra.mxu0 %v2037_v19  ;;  %871 = vmatpush.msra.mxu1 %v2040_v20 }
 0x2ae   :  { %891 = vmatpush.msra.mxu2 %v2043_v21  ;;  %911 = vmatpush.msra.mxu3 %v2046_v22 }
 0x2af   :  { %852 = vmatpush.msra.mxu0 %v2049_v23  ;;  %872 = vmatpush.msra.mxu1 %v2052_v40 }
 0x2b0   :  { %892 = vmatpush.msra.mxu2 %v2055_v41  ;;  %912 = vmatpush.msra.mxu3 %v2058_v42 }
 0x2b1   :  { %853 = vmatpush.msra.mxu0 %v2061_v43  ;;  %873 = vmatpush.msra.mxu1 %v2064_v2  ;;  %v2082_v2 = vld [vmem:[#allocation3 + $0x58] sm:$0xff] }
 0x2b2   :  { %893 = vmatpush.msra.mxu2 %v2067_v3  ;;  %913 = vmatpush.msra.mxu3 %v2070_v5  ;;  %2449 = vst [vmem:[#allocation33_spill] sm:$0xff] %v2082_v2  ;;  %v2085_v3 = vld [vmem:[#allocation3 + $0x20] sm:$0xff]  ;;  %v2088_v5 = vld [vmem:[#allocation3 + $0x28] sm:$0xff] }
 0x2b3   :  { %854 = vmatpush.msra.mxu0 %v2073_v6  ;;  %874 = vmatpush.msra.mxu1 %v2076_v7  ;;  %2450 = vst [vmem:[#allocation6_spill] sm:$0xff] %v2085_v3  ;;  %v2091_v6 = vld [vmem:[#allocation3 + $0x30] sm:$0xff]  ;;  %v2094_v7 = vld [vmem:[#allocation3 + $0x38] sm:$0xff] }
 0x2b4   :  { %894 = vmatpush.msra.mxu2 %v2079_v8  ;;  %914 = vmatpush.msra.mxu3 %v2082_v2  ;;  %2451 = vst [vmem:[#allocation7_spill] sm:$0xff] %v2088_v5  ;;  %v2097_v8 = vld [vmem:[#allocation3] sm:$0xff]  ;;  %v2100_v2 = vld [vmem:[#allocation3 + $0x8] sm:$0xff] }
 0x2b5   :  { %855 = vmatpush.msra.mxu0 %v2085_v3  ;;  %875 = vmatpush.msra.mxu1 %v2088_v5  ;;  %2452 = vst [vmem:[#allocation8_spill] sm:$0xff] %v2091_v6  ;;  %v2103_v3 = vld [vmem:[#allocation3 + $0x10] sm:$0xff]  ;;  %v2106_v5 = vld [vmem:[#allocation3 + $0x18] sm:$0xff] }
 0x2b6   :  { %895 = vmatpush.msra.mxu2 %v2091_v6  ;;  %2453 = vst [vmem:[#allocation9_spill] sm:$0xff] %v2094_v7  ;;  %915 = vmatpush.msra.mxu3 %v2094_v7  ;;  %v597_v6 = vpop.permute.xlu2 %596 }
 0x2b7   :  { %2454 = vst [vmem:[#allocation10_spill] sm:$0xff] %v2097_v8  ;;  %856 = vmatpush.msra.mxu0 %v2097_v8  ;;  %876 = vmatpush.msra.mxu1 %v2100_v2  ;;  %v599_v43 = vmul.f32 %v597_v6, %v2411_v25  ;;  %v600_v7 = vmul.f32 %v597_v6, %v2412_v27 }
 0x2b8   :  { %2455 = vst [vmem:[#allocation11_spill] sm:$0xff] %v2100_v2  ;;  %896 = vmatpush.msra.mxu2 %v2103_v3  ;;  %916 = vmatpush.msra.mxu3 %v2106_v5  ;;  %v601_v22 = vmul.f32 %v597_v6, %v2414_v36 }
 0x2b9   :  { %2456 = vst [vmem:[#allocation12_spill] sm:$0xff] %v2103_v3  ;;  %v603_v42 = vadd.f32 %v599_v43, %v2385_v60  ;;  %v604_v8 = vadd.f32 %v600_v7, %v2413_v30  ;;  %v602_v3 = vmul.f32 %v597_v6, %v2415_v38 }
 0x2ba   :  { %2457 = vst [vmem:[#allocation13_spill] sm:$0xff] %v2106_v5  ;;  %v605_v25 = vadd.f32 %v601_v22, %v2416_v55 }
 0x2bb   :  { %v606_v27 = vadd.f32 %v602_v3, %v1667_v47 }
 0x314   :  { %v624_v41 = vpop.f32.mrf.mxu0  ;;  %v644_v40 = vpop.f32.mrf.mxu1 }
 0x315   :  { %v687_v2 = vadd.f32 %v624_v41, %v603_v42  ;;  %v688_v23 = vadd.f32 %v644_v40, %v604_v8 }
 0x317   :  { %v691_v21 = vmul.f32 0.5, %v687_v2  ;;  %v695_v20 = vmul.f32 0.5, %v688_v23 }
 0x319   :  { %1136 = vtanh.f32 %v691_v21 }
 0x31a   :  { %1138 = vtanh.f32 %v695_v20 }
 0x31b   :  { %v664_v5 = vpop.f32.mrf.mxu2  ;;  %v684_v43 = vpop.f32.mrf.mxu3 }
 0x31c   :  { %v689_v60 = vadd.f32 %v664_v5, %v605_v25  ;;  %v690_v7 = vadd.f32 %v684_v43, %v606_v27 }
 0x31e   :  { %1140 = vtanh.f32 %v689_v60  ;;  %v700_v30 = vmul.f32 0.5, %v690_v7 }
 0x31f   :  { %v1137_v41 = vpop.eup %1136 }
 0x320   :  { %v1139_v40 = vpop.eup %1138  ;;  %v693_v42 = vadd.f32 1.0, %v1137_v41  ;;  %1142 = vtanh.f32 %v700_v30  ;;  %v2458_v30 = vld [vmem:[#allocation15_spill] sm:$0xff] }
 0x321   :  { %v697_v8 = vadd.f32 1.0, %v1139_v40 }
 0x322   :  { %v694_v6 = vmul.f32 0.5, %v693_v42 }
 0x323   :  { %v698_v2 = vmul.f32 0.5, %v697_v8 }
 0x324   :  { %v1141_v23 = vpop.eup %1140 }
 0x325   :  { %v704_v20 = vmul.f32 %v698_v2, %v1990_v4  ;;  %v705_v21 = vmul.f32 %v1141_v23, %v694_v6  ;;  %v2484_v4 = vld [vmem:[#allocation31_spill] sm:$0xff] }
 0x326   :  { %v1143_v22 = vpop.eup %1142 }
 0x327   :  { %v2118_v55 = vadd.f32 %v705_v21, %v704_v20  ;;  %v702_v25 = vadd.f32 1.0, %v1143_v22 }
 0x329   :  { %1144 = vtanh.f32 %v2118_v55  ;;  %v703_v27 = vmul.f32 0.5, %v702_v25 }
 0x32f   :  { %v1145_v60 = vpop.eup %1144 }
 0x330   :  { %v708_v3 = vmul.f32 %v1145_v60, %v703_v27 }
 0x332   :  { %740 = vmatmul.f32.vlgmr.msrb.gmra.mxu0 %v708_v3  ;;  %760 = vmatmul.f32.vlgmr.msrb.gmra.mxu1 %v708_v3 }
 0x333   :  { %780 = vmatmul.f32.vlgmr.msrb.gmra.mxu2 %v708_v3  ;;  %800 = vmatmul.f32.vlgmr.msrb.gmra.mxu3 %v708_v3 }
 0x334   :  { %958 = vmatpush.msrb.mxu0 %v1835_v33  ;;  %978 = vmatpush.msrb.mxu1 %v1838_v34  ;;  %v2459_v33 = vld [vmem:[#allocation16_spill] sm:$0xff]  ;;  %v2460_v34 = vld [vmem:[#allocation17_spill] sm:$0xff] }
 0x335   :  { %998 = vmatpush.msrb.mxu2 %v1841_v48  ;;  %1018 = vmatpush.msrb.mxu3 %v1844_v35  ;;  %v2461_v48 = vld [vmem:[#allocation18_spill] sm:$0xff]  ;;  %v2462_v35 = vld [vmem:[#allocation19_spill] sm:$0xff] }
 0x336   :  { %959 = vmatpush.msrb.mxu0 %v1847_v37  ;;  %979 = vmatpush.msrb.mxu1 %v1850_v39  ;;  %v2463_v37 = vld [vmem:[#allocation20_spill] sm:$0xff]  ;;  %v2464_v39 = vld [vmem:[#allocation21_spill] sm:$0xff] }
 0x337   :  { %999 = vmatpush.msrb.mxu2 %v1853_v57  ;;  %1019 = vmatpush.msrb.mxu3 %v1856_v54  ;;  %v2465_v57 = vld [vmem:[#allocation22_spill] sm:$0xff]  ;;  %v2466_v54 = vld [vmem:[#allocation23_spill] sm:$0xff] }
 0x338   :  { %960 = vmatpush.msrb.mxu0 %v1859_v61  ;;  %980 = vmatpush.msrb.mxu1 %v1862_v62  ;;  %v2467_v61 = vld [vmem:[#allocation24_spill] sm:$0xff]  ;;  %v2468_v62 = vld [vmem:[#allocation25_spill] sm:$0xff] }
 0x339   :  { %1000 = vmatpush.msrb.mxu2 %v1865_v52  ;;  %1020 = vmatpush.msrb.mxu3 %v1868_v56  ;;  %v2469_v52 = vld [vmem:[#allocation26_spill] sm:$0xff]  ;;  %v2470_v56 = vld [vmem:[#allocation27_spill] sm:$0xff] }
 0x33a   :  { %961 = vmatpush.msrb.mxu0 %v1871_v0  ;;  %981 = vmatpush.msrb.mxu1 %v1874_v63  ;;  %v2471_v0 = vld [vmem:[#allocation32_spill] sm:$0xff]  ;;  %v2472_v63 = vld [vmem:[#allocation33_spill] sm:$0xff] }
 0x33b   :  { %1001 = vmatpush.msrb.mxu2 %v1877_v53  ;;  %1021 = vmatpush.msrb.mxu3 %v1880_v58  ;;  %v2473_v53 = vld [vmem:[#allocation6_spill] sm:$0xff]  ;;  %v2474_v58 = vld [vmem:[#allocation7_spill] sm:$0xff] }
 0x33c   :  { %962 = vmatpush.msrb.mxu0 %v1883_v49  ;;  %982 = vmatpush.msrb.mxu1 %v1886_v44  ;;  %v2475_v49 = vld [vmem:[#allocation8_spill] sm:$0xff]  ;;  %v2476_v44 = vld [vmem:[#allocation9_spill] sm:$0xff] }
 0x33d   :  { %1002 = vmatpush.msrb.mxu2 %v1889_v51  ;;  %1022 = vmatpush.msrb.mxu3 %v1892_v46  ;;  %v2477_v51 = vld [vmem:[#allocation10_spill] sm:$0xff]  ;;  %v2478_v46 = vld [vmem:[#allocation11_spill] sm:$0xff] }
 0x33e   :  { %963 = vmatpush.msrb.mxu0 %v1895_v45  ;;  %983 = vmatpush.msrb.mxu1 %v1898_v59  ;;  %v2479_v45 = vld [vmem:[#allocation12_spill] sm:$0xff]  ;;  %v2480_v59 = vld [vmem:[#allocation13_spill] sm:$0xff] }
 0x33f   :  { %1003 = vmatpush.msrb.mxu2 %v1901_v50  ;;  %1023 = vmatpush.msrb.mxu3 %v2426_v26  ;;  %v714_v50 = vpop.permute.xlu2 %713 }
 0x340   :  { %964 = vmatpush.msrb.mxu0 %v2427_v9  ;;  %984 = vmatpush.msrb.mxu1 %v2428_v10 }
 0x341   :  { %1004 = vmatpush.msrb.mxu2 %v2429_v11  ;;  %1024 = vmatpush.msrb.mxu3 %v2430_v12 }
 0x342   :  { %965 = vmatpush.msrb.mxu0 %v2431_v13  ;;  %985 = vmatpush.msrb.mxu1 %v2432_v14  ;;  %v718_v13 = vmul.f32 %v714_v50, %v2414_v36  ;;  %v719_v14 = vmul.f32 %v714_v50, %v2415_v38 }
 0x343   :  { %1005 = vmatpush.msrb.mxu2 %v2433_v15  ;;  %1025 = vmatpush.msrb.mxu3 %v2434_v16 }
 0x344   :  { %966 = vmatpush.msrb.mxu0 %v1931_v29  ;;  %986 = vmatpush.msrb.mxu1 %v1934_v31  ;;  %v2483_v31 = vld [vmem:[#allocation30_spill] sm:$0xff] }
 0x345   :  { %1006 = vmatpush.msrb.mxu2 %v1937_v32  ;;  %1026 = vmatpush.msrb.mxu3 %v1940_v1  ;;  %v2481_v1 = vld [vmem:[#allocation28_spill] sm:$0xff] }
 0x346   :  { %967 = vmatpush.msrb.mxu0 %v1943_v24  ;;  %987 = vmatpush.msrb.mxu1 %v1946_v28  ;;  %v716_v24 = vmul.f32 %v714_v50, %v2481_v1  ;;  %v2482_v28 = vld [vmem:[#allocation29_spill] sm:$0xff] }
 0x347   :  { %1007 = vmatpush.msrb.mxu2 %v2031_v17  ;;  %1027 = vmatpush.msrb.mxu3 %v2034_v18  ;;  %v717_v29 = vmul.f32 %v714_v50, %v2482_v28  ;;  %v2485_v17 = vld [vmem:[#allocation34_spill] sm:$0xff] }
 0x348   :  { %968 = vmatpush.msrb.mxu0 %v2037_v19  ;;  %988 = vmatpush.msrb.mxu1 %v2458_v30  ;;  %v720_v32 = vadd.f32 %v716_v24, %v2483_v31  ;;  %v722_v18 = vadd.f32 %v718_v13, %v2485_v17  ;;  %v723_v19 = vadd.f32 %v719_v14, %v1667_v47 }
 0x349   :  { %1008 = vmatpush.msrb.mxu2 %v2459_v33  ;;  %1028 = vmatpush.msrb.mxu3 %v2460_v34  ;;  %v721_v26 = vadd.f32 %v717_v29, %v2484_v4 }
 0x34a   :  { %969 = vmatpush.msrb.mxu0 %v2461_v48  ;;  %989 = vmatpush.msrb.mxu1 %v2462_v35  ;;  %v831_v48 = vpop.permute.xlu0 %830 }
 0x34b   :  { %1009 = vmatpush.msrb.mxu2 %v2463_v37  ;;  %1029 = vmatpush.msrb.mxu3 %v2464_v39  ;;  %v833_v35 = vmul.f32 %v831_v48, %v2481_v1  ;;  %v834_v37 = vmul.f32 %v831_v48, %v2482_v28 }
 0x34c   :  { %970 = vmatpush.msrb.mxu0 %v2465_v57  ;;  %990 = vmatpush.msrb.mxu1 %v2466_v54 }
 0x34d   :  { %1010 = vmatpush.msrb.mxu2 %v2467_v61  ;;  %1030 = vmatpush.msrb.mxu3 %v2468_v62  ;;  %v837_v39 = vadd.f32 %v833_v35, %v2483_v31 }
 0x34e   :  { %971 = vmatpush.msrb.mxu0 %v2469_v52  ;;  %991 = vmatpush.msrb.mxu1 %v2470_v56  ;;  %v835_v52 = vmul.f32 %v831_v48, %v2414_v36  ;;  %v836_v56 = vmul.f32 %v831_v48, %v2415_v38 }
 0x34f   :  { %1011 = vmatpush.msrb.mxu2 %v2471_v0  ;;  %1031 = vmatpush.msrb.mxu3 %v2472_v63 }
 0x350   :  { %972 = vmatpush.msrb.mxu0 %v2473_v53  ;;  %992 = vmatpush.msrb.mxu1 %v2474_v58  ;;  %v839_v53 = vadd.f32 %v835_v52, %v2485_v17  ;;  %v840_v58 = vadd.f32 %v836_v56, %v1667_v47 }
 0x351   :  { %1012 = vmatpush.msrb.mxu2 %v2475_v49  ;;  %1032 = vmatpush.msrb.mxu3 %v2476_v44 }
 0x352   :  { %973 = vmatpush.msrb.mxu0 %v2477_v51  ;;  %993 = vmatpush.msrb.mxu1 %v2478_v46 }
 0x353   :  { %1013 = vmatpush.msrb.mxu2 %v2479_v45  ;;  %1033 = vmatpush.msrb.mxu3 %v2480_v59 }
 0x3af   :  { %v741_v9 = vpop.f32.mrf.mxu0  ;;  %v761_v10 = vpop.f32.mrf.mxu1 }
 0x3b0   :  { %v804_v11 = vadd.f32 %v741_v9, %v720_v32  ;;  %v805_v12 = vadd.f32 %v761_v10, %v721_v26 }
 0x3b2   :  { %v808_v15 = vmul.f32 0.5, %v804_v11  ;;  %v812_v16 = vmul.f32 0.5, %v805_v12 }
 0x3b4   :  { %1146 = vtanh.f32 %v808_v15 }
 0x3b5   :  { %1148 = vtanh.f32 %v812_v16 }
 0x3b6   :  { %v781_v5 = vpop.f32.mrf.mxu2  ;;  %v801_v43 = vpop.f32.mrf.mxu3 }
 0x3b7   :  { %v806_v7 = vadd.f32 %v781_v5, %v722_v18  ;;  %v807_v41 = vadd.f32 %v801_v43, %v723_v19  ;;  %v948_v19 = vpop.permute.xlu1 %947 }
 0x3b8   :  { %v950_v5 = vmul.f32 %v948_v19, %v2481_v1  ;;  %v951_v43 = vmul.f32 %v948_v19, %v2482_v28 }
 0x3b9   :  { %1150 = vtanh.f32 %v806_v7  ;;  %v817_v40 = vmul.f32 0.5, %v807_v41 }
 0x3ba   :  { %v1147_v42 = vpop.eup %1146  ;;  %v954_v7 = vadd.f32 %v950_v5, %v2483_v31  ;;  %v955_v41 = vadd.f32 %v951_v43, %v2484_v4 }
 0x3bb   :  { %v1149_v8 = vpop.eup %1148  ;;  %v810_v6 = vadd.f32 1.0, %v1147_v42  ;;  %1152 = vtanh.f32 %v817_v40 }
 0x3bc   :  { %v814_v2 = vadd.f32 1.0, %v1149_v8 }
 0x3bd   :  { %v811_v23 = vmul.f32 0.5, %v810_v6 }
 0x3be   :  { %v815_v20 = vmul.f32 0.5, %v814_v2  ;;  %v952_v2 = vmul.f32 %v948_v19, %v2414_v36 }
 0x3bf   :  { %v1151_v21 = vpop.eup %1150 }
 0x3c0   :  { %v821_v22 = vmul.f32 %v815_v20, %v2118_v55  ;;  %v822_v25 = vmul.f32 %v1151_v21, %v811_v23  ;;  %v838_v55 = vadd.f32 %v834_v37, %v2484_v4  ;;  %v953_v23 = vmul.f32 %v948_v19, %v2415_v38 }
 0x3c1   :  { %v1153_v27 = vpop.eup %1152  ;;  %v956_v1 = vadd.f32 %v952_v2, %v2485_v17 }
 0x3c2   :  { %v823_v60 = vadd.f32 %v822_v25, %v821_v22  ;;  %v819_v3 = vadd.f32 1.0, %v1153_v27  ;;  %v957_v28 = vadd.f32 %v953_v23, %v1667_v47 }
 0x3c4   :  { %1154 = vtanh.f32 %v823_v60  ;;  %v820_v30 = vmul.f32 0.5, %v819_v3 }
 0x3ca   :  { %v1155_v33 = vpop.eup %1154 }
 0x3cb   :  { %v825_v34 = vmul.f32 %v1155_v33, %v820_v30 }
 0x3cd   :  { %857 = vmatmul.f32.vlgmr.msra.gmra.mxu0 %v825_v34  ;;  %877 = vmatmul.f32.vlgmr.msra.gmra.mxu1 %v825_v34 }
 0x3ce   :  { %897 = vmatmul.f32.vlgmr.msra.gmra.mxu2 %v825_v34  ;;  %917 = vmatmul.f32.vlgmr.msra.gmra.mxu3 %v825_v34 }
 0x44a   :  { %v858_v57 = vpop.f32.mrf.mxu0  ;;  %v878_v54 = vpop.f32.mrf.mxu1 }
 0x44b   :  { %v921_v61 = vadd.f32 %v858_v57, %v837_v39  ;;  %v922_v62 = vadd.f32 %v878_v54, %v838_v55  ;;  %v1094_v55 = vld [vmem:[%s2220_s4] ss:$0 sm:$0xff] }
 0x44d   :  { %v925_v0 = vmul.f32 0.5, %v921_v61  ;;  %v929_v63 = vmul.f32 0.5, %v922_v62  ;;  %v1095_v62 = vld [vmem:[#allocation2] ss:$0 sm:$0xff] }
 0x44f   :  { %1156 = vtanh.f32 %v925_v0 }
 0x450   :  { %1158 = vtanh.f32 %v929_v63 }
 0x451   :  { %v898_v49 = vpop.f32.mrf.mxu2  ;;  %v918_v44 = vpop.f32.mrf.mxu3 }
 0x452   :  { %v923_v51 = vadd.f32 %v898_v49, %v839_v53  ;;  %v924_v46 = vadd.f32 %v918_v44, %v840_v58 }
 0x454   :  { %1160 = vtanh.f32 %v923_v51  ;;  %v934_v45 = vmul.f32 0.5, %v924_v46 }
 0x455   :  { %v1157_v59 = vpop.eup %1156 }
 0x456   :  { %v1159_v50 = vpop.eup %1158  ;;  %v927_v24 = vadd.f32 1.0, %v1157_v59  ;;  %1162 = vtanh.f32 %v934_v45 }
 0x457   :  { %v931_v29 = vadd.f32 1.0, %v1159_v50 }
 0x458   :  { %v928_v32 = vmul.f32 0.5, %v927_v24 }
 0x459   :  { %v932_v26 = vmul.f32 0.5, %v931_v29 }
 0x45a   :  { %v1161_v9 = vpop.eup %1160 }
 0x45b   :  { %v938_v10 = vmul.f32 %v932_v26, %v823_v60  ;;  %v939_v11 = vmul.f32 %v1161_v9, %v928_v32 }
 0x45c   :  { %v1163_v12 = vpop.eup %1162 }
 0x45d   :  { %v940_v13 = vadd.f32 %v939_v11, %v938_v10  ;;  %v936_v14 = vadd.f32 1.0, %v1163_v12 }
 0x45f   :  { %1164 = vtanh.f32 %v940_v13  ;;  %v937_v15 = vmul.f32 0.5, %v936_v14 }
 0x465   :  { %v1165_v16 = vpop.eup %1164 }
 0x466   :  { %v942_v18 = vmul.f32 %v1165_v16, %v937_v15 }
 0x468   :  { %974 = vmatmul.f32.vlgmr.msrb.gmra.mxu0 %v942_v18  ;;  %994 = vmatmul.f32.vlgmr.msrb.gmra.mxu1 %v942_v18 }
 0x469   :  { %1014 = vmatmul.f32.vlgmr.msrb.gmra.mxu2 %v942_v18  ;;  %1034 = vmatmul.f32.vlgmr.msrb.gmra.mxu3 %v942_v18 }
 0x4e5   :  { %v975_v40 = vpop.f32.mrf.mxu0  ;;  %v995_v42 = vpop.f32.mrf.mxu1 }
 0x4e6   :  { %v1038_v8 = vadd.f32 %v975_v40, %v954_v7  ;;  %v1039_v6 = vadd.f32 %v995_v42, %v955_v41 }
 0x4e8   :  { %v1042_v20 = vmul.f32 0.5, %v1038_v8  ;;  %v1046_v21 = vmul.f32 0.5, %v1039_v6 }
 0x4ea   :  { %1166 = vtanh.f32 %v1042_v20 }
 0x4eb   :  { %1168 = vtanh.f32 %v1046_v21 }
 0x4ec   :  { %v1015_v22 = vpop.f32.mrf.mxu2  ;;  %v1035_v31 = vpop.f32.mrf.mxu3 }
 0x4ed   :  { %v1040_v25 = vadd.f32 %v1015_v22, %v956_v1  ;;  %v1041_v4 = vadd.f32 %v1035_v31, %v957_v28 }
 0x4ef   :  { %1170 = vtanh.f32 %v1040_v25  ;;  %v1051_v27 = vmul.f32 0.5, %v1041_v4 }
 0x4f0   :  { %v1167_v60 = vpop.eup %1166 }
 0x4f1   :  { %v1169_v3 = vpop.eup %1168  ;;  %v1044_v30 = vadd.f32 1.0, %v1167_v60  ;;  %1172 = vtanh.f32 %v1051_v27 }
 0x4f2   :  { %v1048_v36 = vadd.f32 1.0, %v1169_v3 }
 0x4f3   :  { %v1045_v38 = vmul.f32 0.5, %v1044_v30 }
 0x4f4   :  { %v1049_v33 = vmul.f32 0.5, %v1048_v36 }
 0x4f5   :  { %v1171_v34 = vpop.eup %1170 }
 0x4f6   :  { %v1055_v48 = vmul.f32 %v1049_v33, %v940_v13  ;;  %v1056_v35 = vmul.f32 %v1171_v34, %v1045_v38 }
 0x4f7   :  { %v1173_v37 = vpop.eup %1172 }
 0x4f8   :  { %v1057_v17 = vadd.f32 %v1056_v35, %v1055_v48  ;;  %v1053_v47 = vadd.f32 1.0, %v1173_v37 }
 0x4fa   :  { %1174 = vtanh.f32 %v1057_v17  ;;  %v1054_v39 = vmul.f32 0.5, %v1053_v47 }
 0x500   :  { %v1175_v57 = vpop.eup %1174 }
 0x501   :  { %v1059_v54 = vmul.f32 %v1175_v57, %v1054_v39 }
 0x503   :  { %v1064_v61 = vmul.f32 %v1094_v55, %v1059_v54 }
 0x505   :  { %1065 = vadd.xlane.f32.xlu2 %v1064_v61 }
 0x578   :  { %v1066_v52 = vpop.xlane.xlu2 %1065 }
 0x579   :  { %v1071_v56 = vadd.f32 %v1095_v62, %v1066_v52 }
 0x57b   :  { %1073 = vst.msk [vmem:[%s2222_s6] sm:$0xff] %vm1072_vm0, %v1071_v56 }
 0x57c   :  { %1078 = vsyncpa [#allocation4], 1 }

</bundles_post_ra>
